<compile_context>
chip_gen: v5e
topology: v5e:2x2
jax: 0.10.0
libtpu: 0.0.40
codegen_flags: <defaults>
</compile_context>

<pallas_src>
import functools

import jax
import jax.numpy as jnp
from jax import lax
from jax.experimental import pallas as pl
from jax.experimental.pallas import tpu as pltpu


def bio_lstm_kernel(gx0_ref,          # (T, B, 4H)     f32  precomputed x@W_ih0 + b0
                    whh0_ref,         # (H, 4H)        f32  layer-0 hidden weights
                    wcat1_ref,        # (2H, 4H)       f32  [W_ih1; W_hh1] (layer 1)
                    b1_ref,           # (1, 4H)        f32  b_ih1 + b_hh1
                    wlin_ref,         # (H, num_class) f32
                    blin_ref,         # (1, num_class) f32
                    out_ref):         # (B, num_class) f32
    T, B, G4 = gx0_ref.shape
    H = whh0_ref.shape[0]

    whh0 = whh0_ref[...]
    wcat1 = wcat1_ref[...]
    # Hoisted broadcast: JAX does not CSE broadcast_in_dim, so do it once here.
    b1 = jnp.broadcast_to(b1_ref[...], (B, G4))

    zeros = jnp.zeros((B, H), jnp.float32)

    def apply_gates(gates, c):
        # One full-width sigmoid pass + one full-width tanh pass (EUP), then slice.
        s = jax.nn.sigmoid(gates)          # (B, 4H)
        th = jnp.tanh(gates)               # (B, 4H)
        i = s[:, 0 * H:1 * H]
        f = s[:, 1 * H:2 * H]
        g = th[:, 2 * H:3 * H]
        o = s[:, 3 * H:4 * H]
        c_new = f * c + i * g
        h_new = o * jnp.tanh(c_new)
        return h_new, c_new

    def body(t, carry):
        h0, c0, h1, c1 = carry
        # ---- layer 0: input projection precomputed; only the hidden matmul remains.
        gates0 = gx0_ref[t] + jnp.dot(h0, whh0, preferred_element_type=jnp.float32)
        h0, c0 = apply_gates(gates0, c0)
        # ---- layer 1: single fused matmul over the concatenated [h0, h1] input.
        hx = jnp.concatenate([h0, h1], axis=1)                    # (B, 2H)
        gates1 = jnp.dot(hx, wcat1, preferred_element_type=jnp.float32) + b1
        h1, c1 = apply_gates(gates1, c1)
        return (h0, c0, h1, c1)

    # T is static (=8) -> fully unroll so adjacent steps can overlap on the scheduler.
    _, _, h1, _ = lax.fori_loop(0, T, body, (zeros, zeros, zeros, zeros), unroll=True)

    # final linear on last time step of the top layer
    logits = jnp.dot(h1, wlin_ref[...], preferred_element_type=jnp.float32) + blin_ref[...]

    # log_softmax over class axis
    m = jnp.max(logits, axis=-1, keepdims=True)
    lse = jnp.log(jnp.sum(jnp.exp(logits - m), axis=-1, keepdims=True)) + m
    out_ref[...] = logits - lse


def bio_lstm_forward(x, params):
    """x: (batch, input_size, sequence) float32 — matches PyTorch call signature."""
    B, D_in, T = x.shape
    H = params["w_hh0"].shape[0]
    num_class = params["w_lin"].shape[1]

    # Hoisted layer-0 input projection (plain XLA, one matmul for all T*B rows).
    # This simultaneously performs the PyTorch time-unstack + transpose: result is
    # time-major (T, B, 4H), lane-aligned (4H = 128 for H = 32). Bias b0 folded here.
    gx0 = (
        jnp.einsum("bdt,dg->tbg", x.astype(jnp.float32), params["w_ih0"],
                   preferred_element_type=jnp.float32)
        + params["b0"]
    )

    vmem = functools.partial(pl.BlockSpec, memory_space=pltpu.MemorySpace.VMEM)
    operands = (
        gx0,
        params["w_hh0"],
        params["w_cat1"], params["b1"],
        params["w_lin"], params["b_lin"],
    )

    return pl.pallas_call(
        bio_lstm_kernel,
        out_shape=jax.ShapeDtypeStruct((B, num_class), jnp.float32),
        in_specs=[vmem() for _ in operands],
        out_specs=vmem(),
    )(*operands)


def init_params(key, input_size, hidden, num_class):
    """Deterministic PyTorch-style init: U(-1/sqrt(H), 1/sqrt(H)). Weights are
    stored pre-transposed to (in, out); layer-1 input/hidden weights are
    pre-concatenated along the input axis to match the in-kernel [h0, h1] concat."""
    ks = jax.random.split(key, 12)
    bound = 1.0 / jnp.sqrt(hidden)

    def u(k, shape):
        return jax.random.uniform(k, shape, jnp.float32, -bound, bound)

    # layer 0
    w_ih0 = u(ks[0], (4 * hidden, input_size)).T                          # (D_in, 4H)
    w_hh0 = u(ks[1], (4 * hidden, hidden)).T                               # (H, 4H)
    b0 = (u(ks[2], (4 * hidden,)) + u(ks[3], (4 * hidden,)))[None, :]      # (1, 4H)
    # layer 1  (concat order MUST match in-kernel [h0 (input), h1 (hidden)])
    w_ih1 = u(ks[4], (4 * hidden, hidden)).T                               # (H, 4H)
    w_hh1 = u(ks[5], (4 * hidden, hidden)).T                               # (H, 4H)
    w_cat1 = jnp.concatenate([w_ih1, w_hh1], axis=0)                       # (2H, 4H)
    b1 = (u(ks[6], (4 * hidden,)) + u(ks[7], (4 * hidden,)))[None, :]      # (1, 4H)
    # linear
    w_lin = u(ks[8], (num_class, hidden)).T                                # (H, num_class)
    b_lin = u(ks[9], (num_class,))[None, :]                                # (1, num_class)

    return {
        "w_ih0": w_ih0, "w_hh0": w_hh0, "b0": b0,
        "w_cat1": w_cat1, "b1": b1,
        "w_lin": w_lin, "b_lin": b_lin,
    }


if __name__ == "__main__":
    batch = 8
    input_size = 19     # module default input_size
    hidden = 32         # small hidden size
    num_class = 20      # num_class from the script
    seq = 8             # sequence length

    key = jax.random.PRNGKey(0)
    k_x, k_p = jax.random.split(key)

    x = jax.random.normal(k_x, (batch, input_size, seq), jnp.float32)
    params = init_params(k_p, input_size, hidden, num_class)

    out = bio_lstm_forward(x, params)
    out = jax.block_until_ready(out)

    assert out.shape == (batch, num_class)
    assert bool(jnp.all(jnp.isfinite(out)))
    # log_softmax rows should exponentiate-and-sum to ~1
    assert bool(jnp.allclose(jnp.sum(jnp.exp(out), axis=1), 1.0, atol=1e-4))

    print("KERNEL_OK")
</pallas_src>

<mosaic_0001>
module attributes {stable_mosaic.version = 11 : i64} {
  func.func @bio_lstm_kernel(%arg0: memref<8x8x128xf32, #tpu.memory_space<vmem>>, %arg1: memref<32x128xf32, #tpu.memory_space<vmem>>, %arg2: memref<64x128xf32, #tpu.memory_space<vmem>>, %arg3: memref<1x128xf32, #tpu.memory_space<vmem>>, %arg4: memref<32x20xf32, #tpu.memory_space<vmem>>, %arg5: memref<1x20xf32, #tpu.memory_space<vmem>>, %arg6: memref<8x20xf32, #tpu.memory_space<vmem>>) attributes {dimension_semantics = [], scalar_prefetch = 0 : i64, scratch_operands = 0 : i64, tpu.core_type = #tpu.core_type<tc>} {
    %c0 = arith.constant 0 : index
    %c0_0 = arith.constant 0 : index
    %0 = vector.load %arg1[%c0, %c0_0] : memref<32x128xf32, #tpu.memory_space<vmem>>, vector<32x128xf32>
    %c0_1 = arith.constant 0 : index
    %c0_2 = arith.constant 0 : index
    %1 = vector.load %arg2[%c0_1, %c0_2] : memref<64x128xf32, #tpu.memory_space<vmem>>, vector<64x128xf32>
    %c0_3 = arith.constant 0 : index
    %c0_4 = arith.constant 0 : index
    %2 = vector.load %arg3[%c0_3, %c0_4] : memref<1x128xf32, #tpu.memory_space<vmem>>, vector<1x128xf32>
    %3 = vector.shape_cast %2 : vector<1x128xf32> to vector<1x128xf32>
    %4 = vector.broadcast %3 : vector<1x128xf32> to vector<8x128xf32>
    %cst = arith.constant 0.000000e+00 : f32
    %5 = vector.broadcast %cst : f32 to vector<8x32xf32>
    %c0_i32 = arith.constant 0 : i32
    %6 = arith.index_cast %c0_i32 : i32 to index
    %c0_5 = arith.constant 0 : index
    %c0_6 = arith.constant 0 : index
    %7 = vector.load %arg0[%6, %c0_5, %c0_6] : memref<8x8x128xf32, #tpu.memory_space<vmem>>, vector<1x8x128xf32>
    %8 = vector.shape_cast %7 : vector<1x8x128xf32> to vector<8x128xf32>
    %cst_7 = arith.constant dense<0.000000e+00> : vector<8x128xf32>
    %9 = tpu.matmul %5, %0, %cst_7 {dimension_numbers = #tpu.dot_dimension_numbers<[1], [0], [0], [1], [0, 0, 1, 1], [], []>} : vector<8x32xf32>, vector<32x128xf32>, vector<8x128xf32> -> vector<8x128xf32>
    %10 = arith.addf %8, %9 : vector<8x128xf32>
    %11 = arith.negf %10 : vector<8x128xf32>
    %12 = math.exp %11 : vector<8x128xf32>
    %cst_8 = arith.constant 1.000000e+00 : f32
    %13 = vector.broadcast %cst_8 : f32 to vector<8x128xf32>
    %14 = arith.addf %13, %12 : vector<8x128xf32>
    %15 = arith.divf %13, %14 : vector<8x128xf32>
    %16 = math.tanh %10 : vector<8x128xf32>
    %17 = vector.extract_strided_slice %15 {offsets = [0, 0], sizes = [8, 32], strides = [1, 1]} : vector<8x128xf32> to vector<8x32xf32>
    %18 = vector.extract_strided_slice %15 {offsets = [0, 32], sizes = [8, 32], strides = [1, 1]} : vector<8x128xf32> to vector<8x32xf32>
    %19 = vector.extract_strided_slice %16 {offsets = [0, 64], sizes = [8, 32], strides = [1, 1]} : vector<8x128xf32> to vector<8x32xf32>
    %20 = vector.extract_strided_slice %15 {offsets = [0, 96], sizes = [8, 32], strides = [1, 1]} : vector<8x128xf32> to vector<8x32xf32>
    %21 = arith.mulf %18, %5 : vector<8x32xf32>
    %22 = arith.mulf %17, %19 : vector<8x32xf32>
    %23 = arith.addf %21, %22 : vector<8x32xf32>
    %24 = math.tanh %23 : vector<8x32xf32>
    %25 = arith.mulf %20, %24 : vector<8x32xf32>
    %26 = tpu.concatenate %25, %5 in 1 : vector<8x32xf32>, vector<8x32xf32> -> vector<8x64xf32>
    %cst_9 = arith.constant dense<0.000000e+00> : vector<8x128xf32>
    %27 = tpu.matmul %26, %1, %cst_9 {dimension_numbers = #tpu.dot_dimension_numbers<[1], [0], [0], [1], [0, 0, 1, 1], [], []>} : vector<8x64xf32>, vector<64x128xf32>, vector<8x128xf32> -> vector<8x128xf32>
    %28 = arith.addf %27, %4 : vector<8x128xf32>
    %29 = arith.negf %28 : vector<8x128xf32>
    %30 = math.exp %29 : vector<8x128xf32>
    %cst_10 = arith.constant 1.000000e+00 : f32
    %31 = vector.broadcast %cst_10 : f32 to vector<8x128xf32>
    %32 = arith.addf %31, %30 : vector<8x128xf32>
    %33 = arith.divf %31, %32 : vector<8x128xf32>
    %34 = math.tanh %28 : vector<8x128xf32>
    %35 = vector.extract_strided_slice %33 {offsets = [0, 0], sizes = [8, 32], strides = [1, 1]} : vector<8x128xf32> to vector<8x32xf32>
    %36 = vector.extract_strided_slice %33 {offsets = [0, 32], sizes = [8, 32], strides = [1, 1]} : vector<8x128xf32> to vector<8x32xf32>
    %37 = vector.extract_strided_slice %34 {offsets = [0, 64], sizes = [8, 32], strides = [1, 1]} : vector<8x128xf32> to vector<8x32xf32>
    %38 = vector.extract_strided_slice %33 {offsets = [0, 96], sizes = [8, 32], strides = [1, 1]} : vector<8x128xf32> to vector<8x32xf32>
    %39 = arith.mulf %36, %5 : vector<8x32xf32>
    %40 = arith.mulf %35, %37 : vector<8x32xf32>
    %41 = arith.addf %39, %40 : vector<8x32xf32>
    %42 = math.tanh %41 : vector<8x32xf32>
    %43 = arith.mulf %38, %42 : vector<8x32xf32>
    %c1_i32 = arith.constant 1 : i32
    %44 = arith.index_cast %c1_i32 : i32 to index
    %c0_11 = arith.constant 0 : index
    %c0_12 = arith.constant 0 : index
    %45 = vector.load %arg0[%44, %c0_11, %c0_12] : memref<8x8x128xf32, #tpu.memory_space<vmem>>, vector<1x8x128xf32>
    %46 = vector.shape_cast %45 : vector<1x8x128xf32> to vector<8x128xf32>
    %cst_13 = arith.constant dense<0.000000e+00> : vector<8x128xf32>
    %47 = tpu.matmul %25, %0, %cst_13 {dimension_numbers = #tpu.dot_dimension_numbers<[1], [0], [0], [1], [0, 0, 1, 1], [], []>} : vector<8x32xf32>, vector<32x128xf32>, vector<8x128xf32> -> vector<8x128xf32>
    %48 = arith.addf %46, %47 : vector<8x128xf32>
    %49 = arith.negf %48 : vector<8x128xf32>
    %50 = math.exp %49 : vector<8x128xf32>
    %cst_14 = arith.constant 1.000000e+00 : f32
    %51 = vector.broadcast %cst_14 : f32 to vector<8x128xf32>
    %52 = arith.addf %51, %50 : vector<8x128xf32>
    %53 = arith.divf %51, %52 : vector<8x128xf32>
    %54 = math.tanh %48 : vector<8x128xf32>
    %55 = vector.extract_strided_slice %53 {offsets = [0, 0], sizes = [8, 32], strides = [1, 1]} : vector<8x128xf32> to vector<8x32xf32>
    %56 = vector.extract_strided_slice %53 {offsets = [0, 32], sizes = [8, 32], strides = [1, 1]} : vector<8x128xf32> to vector<8x32xf32>
    %57 = vector.extract_strided_slice %54 {offsets = [0, 64], sizes = [8, 32], strides = [1, 1]} : vector<8x128xf32> to vector<8x32xf32>
    %58 = vector.extract_strided_slice %53 {offsets = [0, 96], sizes = [8, 32], strides = [1, 1]} : vector<8x128xf32> to vector<8x32xf32>
    %59 = arith.mulf %56, %23 : vector<8x32xf32>
    %60 = arith.mulf %55, %57 : vector<8x32xf32>
    %61 = arith.addf %59, %60 : vector<8x32xf32>
    %62 = math.tanh %61 : vector<8x32xf32>
    %63 = arith.mulf %58, %62 : vector<8x32xf32>
    %64 = tpu.concatenate %63, %43 in 1 : vector<8x32xf32>, vector<8x32xf32> -> vector<8x64xf32>
    %cst_15 = arith.constant dense<0.000000e+00> : vector<8x128xf32>
    %65 = tpu.matmul %64, %1, %cst_15 {dimension_numbers = #tpu.dot_dimension_numbers<[1], [0], [0], [1], [0, 0, 1, 1], [], []>} : vector<8x64xf32>, vector<64x128xf32>, vector<8x128xf32> -> vector<8x128xf32>
    %66 = arith.addf %65, %4 : vector<8x128xf32>
    %67 = arith.negf %66 : vector<8x128xf32>
    %68 = math.exp %67 : vector<8x128xf32>
    %cst_16 = arith.constant 1.000000e+00 : f32
    %69 = vector.broadcast %cst_16 : f32 to vector<8x128xf32>
    %70 = arith.addf %69, %68 : vector<8x128xf32>
    %71 = arith.divf %69, %70 : vector<8x128xf32>
    %72 = math.tanh %66 : vector<8x128xf32>
    %73 = vector.extract_strided_slice %71 {offsets = [0, 0], sizes = [8, 32], strides = [1, 1]} : vector<8x128xf32> to vector<8x32xf32>
    %74 = vector.extract_strided_slice %71 {offsets = [0, 32], sizes = [8, 32], strides = [1, 1]} : vector<8x128xf32> to vector<8x32xf32>
    %75 = vector.extract_strided_slice %72 {offsets = [0, 64], sizes = [8, 32], strides = [1, 1]} : vector<8x128xf32> to vector<8x32xf32>
    %76 = vector.extract_strided_slice %71 {offsets = [0, 96], sizes = [8, 32], strides = [1, 1]} : vector<8x128xf32> to vector<8x32xf32>
    %77 = arith.mulf %74, %41 : vector<8x32xf32>
    %78 = arith.mulf %73, %75 : vector<8x32xf32>
    %79 = arith.addf %77, %78 : vector<8x32xf32>
    %80 = math.tanh %79 : vector<8x32xf32>
    %81 = arith.mulf %76, %80 : vector<8x32xf32>
    %c2_i32 = arith.constant 2 : i32
    %82 = arith.index_cast %c2_i32 : i32 to index
    %c0_17 = arith.constant 0 : index
    %c0_18 = arith.constant 0 : index
    %83 = vector.load %arg0[%82, %c0_17, %c0_18] : memref<8x8x128xf32, #tpu.memory_space<vmem>>, vector<1x8x128xf32>
    %84 = vector.shape_cast %83 : vector<1x8x128xf32> to vector<8x128xf32>
    %cst_19 = arith.constant dense<0.000000e+00> : vector<8x128xf32>
    %85 = tpu.matmul %63, %0, %cst_19 {dimension_numbers = #tpu.dot_dimension_numbers<[1], [0], [0], [1], [0, 0, 1, 1], [], []>} : vector<8x32xf32>, vector<32x128xf32>, vector<8x128xf32> -> vector<8x128xf32>
    %86 = arith.addf %84, %85 : vector<8x128xf32>
    %87 = arith.negf %86 : vector<8x128xf32>
    %88 = math.exp %87 : vector<8x128xf32>
    %cst_20 = arith.constant 1.000000e+00 : f32
    %89 = vector.broadcast %cst_20 : f32 to vector<8x128xf32>
    %90 = arith.addf %89, %88 : vector<8x128xf32>
    %91 = arith.divf %89, %90 : vector<8x128xf32>
    %92 = math.tanh %86 : vector<8x128xf32>
    %93 = vector.extract_strided_slice %91 {offsets = [0, 0], sizes = [8, 32], strides = [1, 1]} : vector<8x128xf32> to vector<8x32xf32>
    %94 = vector.extract_strided_slice %91 {offsets = [0, 32], sizes = [8, 32], strides = [1, 1]} : vector<8x128xf32> to vector<8x32xf32>
    %95 = vector.extract_strided_slice %92 {offsets = [0, 64], sizes = [8, 32], strides = [1, 1]} : vector<8x128xf32> to vector<8x32xf32>
    %96 = vector.extract_strided_slice %91 {offsets = [0, 96], sizes = [8, 32], strides = [1, 1]} : vector<8x128xf32> to vector<8x32xf32>
    %97 = arith.mulf %94, %61 : vector<8x32xf32>
    %98 = arith.mulf %93, %95 : vector<8x32xf32>
    %99 = arith.addf %97, %98 : vector<8x32xf32>
    %100 = math.tanh %99 : vector<8x32xf32>
    %101 = arith.mulf %96, %100 : vector<8x32xf32>
    %102 = tpu.concatenate %101, %81 in 1 : vector<8x32xf32>, vector<8x32xf32> -> vector<8x64xf32>
    %cst_21 = arith.constant dense<0.000000e+00> : vector<8x128xf32>
    %103 = tpu.matmul %102, %1, %cst_21 {dimension_numbers = #tpu.dot_dimension_numbers<[1], [0], [0], [1], [0, 0, 1, 1], [], []>} : vector<8x64xf32>, vector<64x128xf32>, vector<8x128xf32> -> vector<8x128xf32>
    %104 = arith.addf %103, %4 : vector<8x128xf32>
    %105 = arith.negf %104 : vector<8x128xf32>
    %106 = math.exp %105 : vector<8x128xf32>
    %cst_22 = arith.constant 1.000000e+00 : f32
    %107 = vector.broadcast %cst_22 : f32 to vector<8x128xf32>
    %108 = arith.addf %107, %106 : vector<8x128xf32>
    %109 = arith.divf %107, %108 : vector<8x128xf32>
    %110 = math.tanh %104 : vector<8x128xf32>
    %111 = vector.extract_strided_slice %109 {offsets = [0, 0], sizes = [8, 32], strides = [1, 1]} : vector<8x128xf32> to vector<8x32xf32>
    %112 = vector.extract_strided_slice %109 {offsets = [0, 32], sizes = [8, 32], strides = [1, 1]} : vector<8x128xf32> to vector<8x32xf32>
    %113 = vector.extract_strided_slice %110 {offsets = [0, 64], sizes = [8, 32], strides = [1, 1]} : vector<8x128xf32> to vector<8x32xf32>
    %114 = vector.extract_strided_slice %109 {offsets = [0, 96], sizes = [8, 32], strides = [1, 1]} : vector<8x128xf32> to vector<8x32xf32>
    %115 = arith.mulf %112, %79 : vector<8x32xf32>
    %116 = arith.mulf %111, %113 : vector<8x32xf32>
    %117 = arith.addf %115, %116 : vector<8x32xf32>
    %118 = math.tanh %117 : vector<8x32xf32>
    %119 = arith.mulf %114, %118 : vector<8x32xf32>
    %c3_i32 = arith.constant 3 : i32
    %120 = arith.index_cast %c3_i32 : i32 to index
    %c0_23 = arith.constant 0 : index
    %c0_24 = arith.constant 0 : index
    %121 = vector.load %arg0[%120, %c0_23, %c0_24] : memref<8x8x128xf32, #tpu.memory_space<vmem>>, vector<1x8x128xf32>
    %122 = vector.shape_cast %121 : vector<1x8x128xf32> to vector<8x128xf32>
    %cst_25 = arith.constant dense<0.000000e+00> : vector<8x128xf32>
    %123 = tpu.matmul %101, %0, %cst_25 {dimension_numbers = #tpu.dot_dimension_numbers<[1], [0], [0], [1], [0, 0, 1, 1], [], []>} : vector<8x32xf32>, vector<32x128xf32>, vector<8x128xf32> -> vector<8x128xf32>
    %124 = arith.addf %122, %123 : vector<8x128xf32>
    %125 = arith.negf %124 : vector<8x128xf32>
    %126 = math.exp %125 : vector<8x128xf32>
    %cst_26 = arith.constant 1.000000e+00 : f32
    %127 = vector.broadcast %cst_26 : f32 to vector<8x128xf32>
    %128 = arith.addf %127, %126 : vector<8x128xf32>
    %129 = arith.divf %127, %128 : vector<8x128xf32>
    %130 = math.tanh %124 : vector<8x128xf32>
    %131 = vector.extract_strided_slice %129 {offsets = [0, 0], sizes = [8, 32], strides = [1, 1]} : vector<8x128xf32> to vector<8x32xf32>
    %132 = vector.extract_strided_slice %129 {offsets = [0, 32], sizes = [8, 32], strides = [1, 1]} : vector<8x128xf32> to vector<8x32xf32>
    %133 = vector.extract_strided_slice %130 {offsets = [0, 64], sizes = [8, 32], strides = [1, 1]} : vector<8x128xf32> to vector<8x32xf32>
    %134 = vector.extract_strided_slice %129 {offsets = [0, 96], sizes = [8, 32], strides = [1, 1]} : vector<8x128xf32> to vector<8x32xf32>
    %135 = arith.mulf %132, %99 : vector<8x32xf32>
    %136 = arith.mulf %131, %133 : vector<8x32xf32>
    %137 = arith.addf %135, %136 : vector<8x32xf32>
    %138 = math.tanh %137 : vector<8x32xf32>
    %139 = arith.mulf %134, %138 : vector<8x32xf32>
    %140 = tpu.concatenate %139, %119 in 1 : vector<8x32xf32>, vector<8x32xf32> -> vector<8x64xf32>
    %cst_27 = arith.constant dense<0.000000e+00> : vector<8x128xf32>
    %141 = tpu.matmul %140, %1, %cst_27 {dimension_numbers = #tpu.dot_dimension_numbers<[1], [0], [0], [1], [0, 0, 1, 1], [], []>} : vector<8x64xf32>, vector<64x128xf32>, vector<8x128xf32> -> vector<8x128xf32>
    %142 = arith.addf %141, %4 : vector<8x128xf32>
    %143 = arith.negf %142 : vector<8x128xf32>
    %144 = math.exp %143 : vector<8x128xf32>
    %cst_28 = arith.constant 1.000000e+00 : f32
    %145 = vector.broadcast %cst_28 : f32 to vector<8x128xf32>
    %146 = arith.addf %145, %144 : vector<8x128xf32>
    %147 = arith.divf %145, %146 : vector<8x128xf32>
    %148 = math.tanh %142 : vector<8x128xf32>
    %149 = vector.extract_strided_slice %147 {offsets = [0, 0], sizes = [8, 32], strides = [1, 1]} : vector<8x128xf32> to vector<8x32xf32>
    %150 = vector.extract_strided_slice %147 {offsets = [0, 32], sizes = [8, 32], strides = [1, 1]} : vector<8x128xf32> to vector<8x32xf32>
    %151 = vector.extract_strided_slice %148 {offsets = [0, 64], sizes = [8, 32], strides = [1, 1]} : vector<8x128xf32> to vector<8x32xf32>
    %152 = vector.extract_strided_slice %147 {offsets = [0, 96], sizes = [8, 32], strides = [1, 1]} : vector<8x128xf32> to vector<8x32xf32>
    %153 = arith.mulf %150, %117 : vector<8x32xf32>
    %154 = arith.mulf %149, %151 : vector<8x32xf32>
    %155 = arith.addf %153, %154 : vector<8x32xf32>
    %156 = math.tanh %155 : vector<8x32xf32>
    %157 = arith.mulf %152, %156 : vector<8x32xf32>
    %c4_i32 = arith.constant 4 : i32
    %158 = arith.index_cast %c4_i32 : i32 to index
    %c0_29 = arith.constant 0 : index
    %c0_30 = arith.constant 0 : index
    %159 = vector.load %arg0[%158, %c0_29, %c0_30] : memref<8x8x128xf32, #tpu.memory_space<vmem>>, vector<1x8x128xf32>
    %160 = vector.shape_cast %159 : vector<1x8x128xf32> to vector<8x128xf32>
    %cst_31 = arith.constant dense<0.000000e+00> : vector<8x128xf32>
    %161 = tpu.matmul %139, %0, %cst_31 {dimension_numbers = #tpu.dot_dimension_numbers<[1], [0], [0], [1], [0, 0, 1, 1], [], []>} : vector<8x32xf32>, vector<32x128xf32>, vector<8x128xf32> -> vector<8x128xf32>
    %162 = arith.addf %160, %161 : vector<8x128xf32>
    %163 = arith.negf %162 : vector<8x128xf32>
    %164 = math.exp %163 : vector<8x128xf32>
    %cst_32 = arith.constant 1.000000e+00 : f32
    %165 = vector.broadcast %cst_32 : f32 to vector<8x128xf32>
    %166 = arith.addf %165, %164 : vector<8x128xf32>
    %167 = arith.divf %165, %166 : vector<8x128xf32>
    %168 = math.tanh %162 : vector<8x128xf32>
    %169 = vector.extract_strided_slice %167 {offsets = [0, 0], sizes = [8, 32], strides = [1, 1]} : vector<8x128xf32> to vector<8x32xf32>
    %170 = vector.extract_strided_slice %167 {offsets = [0, 32], sizes = [8, 32], strides = [1, 1]} : vector<8x128xf32> to vector<8x32xf32>
    %171 = vector.extract_strided_slice %168 {offsets = [0, 64], sizes = [8, 32], strides = [1, 1]} : vector<8x128xf32> to vector<8x32xf32>
    %172 = vector.extract_strided_slice %167 {offsets = [0, 96], sizes = [8, 32], strides = [1, 1]} : vector<8x128xf32> to vector<8x32xf32>
    %173 = arith.mulf %170, %137 : vector<8x32xf32>
    %174 = arith.mulf %169, %171 : vector<8x32xf32>
    %175 = arith.addf %173, %174 : vector<8x32xf32>
    %176 = math.tanh %175 : vector<8x32xf32>
    %177 = arith.mulf %172, %176 : vector<8x32xf32>
    %178 = tpu.concatenate %177, %157 in 1 : vector<8x32xf32>, vector<8x32xf32> -> vector<8x64xf32>
    %cst_33 = arith.constant dense<0.000000e+00> : vector<8x128xf32>
    %179 = tpu.matmul %178, %1, %cst_33 {dimension_numbers = #tpu.dot_dimension_numbers<[1], [0], [0], [1], [0, 0, 1, 1], [], []>} : vector<8x64xf32>, vector<64x128xf32>, vector<8x128xf32> -> vector<8x128xf32>
    %180 = arith.addf %179, %4 : vector<8x128xf32>
    %181 = arith.negf %180 : vector<8x128xf32>
    %182 = math.exp %181 : vector<8x128xf32>
    %cst_34 = arith.constant 1.000000e+00 : f32
    %183 = vector.broadcast %cst_34 : f32 to vector<8x128xf32>
    %184 = arith.addf %183, %182 : vector<8x128xf32>
    %185 = arith.divf %183, %184 : vector<8x128xf32>
    %186 = math.tanh %180 : vector<8x128xf32>
    %187 = vector.extract_strided_slice %185 {offsets = [0, 0], sizes = [8, 32], strides = [1, 1]} : vector<8x128xf32> to vector<8x32xf32>
    %188 = vector.extract_strided_slice %185 {offsets = [0, 32], sizes = [8, 32], strides = [1, 1]} : vector<8x128xf32> to vector<8x32xf32>
    %189 = vector.extract_strided_slice %186 {offsets = [0, 64], sizes = [8, 32], strides = [1, 1]} : vector<8x128xf32> to vector<8x32xf32>
    %190 = vector.extract_strided_slice %185 {offsets = [0, 96], sizes = [8, 32], strides = [1, 1]} : vector<8x128xf32> to vector<8x32xf32>
    %191 = arith.mulf %188, %155 : vector<8x32xf32>
    %192 = arith.mulf %187, %189 : vector<8x32xf32>
    %193 = arith.addf %191, %192 : vector<8x32xf32>
    %194 = math.tanh %193 : vector<8x32xf32>
    %195 = arith.mulf %190, %194 : vector<8x32xf32>
    %c5_i32 = arith.constant 5 : i32
    %196 = arith.index_cast %c5_i32 : i32 to index
    %c0_35 = arith.constant 0 : index
    %c0_36 = arith.constant 0 : index
    %197 = vector.load %arg0[%196, %c0_35, %c0_36] : memref<8x8x128xf32, #tpu.memory_space<vmem>>, vector<1x8x128xf32>
    %198 = vector.shape_cast %197 : vector<1x8x128xf32> to vector<8x128xf32>
    %cst_37 = arith.constant dense<0.000000e+00> : vector<8x128xf32>
    %199 = tpu.matmul %177, %0, %cst_37 {dimension_numbers = #tpu.dot_dimension_numbers<[1], [0], [0], [1], [0, 0, 1, 1], [], []>} : vector<8x32xf32>, vector<32x128xf32>, vector<8x128xf32> -> vector<8x128xf32>
    %200 = arith.addf %198, %199 : vector<8x128xf32>
    %201 = arith.negf %200 : vector<8x128xf32>
    %202 = math.exp %201 : vector<8x128xf32>
    %cst_38 = arith.constant 1.000000e+00 : f32
    %203 = vector.broadcast %cst_38 : f32 to vector<8x128xf32>
    %204 = arith.addf %203, %202 : vector<8x128xf32>
    %205 = arith.divf %203, %204 : vector<8x128xf32>
    %206 = math.tanh %200 : vector<8x128xf32>
    %207 = vector.extract_strided_slice %205 {offsets = [0, 0], sizes = [8, 32], strides = [1, 1]} : vector<8x128xf32> to vector<8x32xf32>
    %208 = vector.extract_strided_slice %205 {offsets = [0, 32], sizes = [8, 32], strides = [1, 1]} : vector<8x128xf32> to vector<8x32xf32>
    %209 = vector.extract_strided_slice %206 {offsets = [0, 64], sizes = [8, 32], strides = [1, 1]} : vector<8x128xf32> to vector<8x32xf32>
    %210 = vector.extract_strided_slice %205 {offsets = [0, 96], sizes = [8, 32], strides = [1, 1]} : vector<8x128xf32> to vector<8x32xf32>
    %211 = arith.mulf %208, %175 : vector<8x32xf32>
    %212 = arith.mulf %207, %209 : vector<8x32xf32>
    %213 = arith.addf %211, %212 : vector<8x32xf32>
    %214 = math.tanh %213 : vector<8x32xf32>
    %215 = arith.mulf %210, %214 : vector<8x32xf32>
    %216 = tpu.concatenate %215, %195 in 1 : vector<8x32xf32>, vector<8x32xf32> -> vector<8x64xf32>
    %cst_39 = arith.constant dense<0.000000e+00> : vector<8x128xf32>
    %217 = tpu.matmul %216, %1, %cst_39 {dimension_numbers = #tpu.dot_dimension_numbers<[1], [0], [0], [1], [0, 0, 1, 1], [], []>} : vector<8x64xf32>, vector<64x128xf32>, vector<8x128xf32> -> vector<8x128xf32>
    %218 = arith.addf %217, %4 : vector<8x128xf32>
    %219 = arith.negf %218 : vector<8x128xf32>
    %220 = math.exp %219 : vector<8x128xf32>
    %cst_40 = arith.constant 1.000000e+00 : f32
    %221 = vector.broadcast %cst_40 : f32 to vector<8x128xf32>
    %222 = arith.addf %221, %220 : vector<8x128xf32>
    %223 = arith.divf %221, %222 : vector<8x128xf32>
    %224 = math.tanh %218 : vector<8x128xf32>
    %225 = vector.extract_strided_slice %223 {offsets = [0, 0], sizes = [8, 32], strides = [1, 1]} : vector<8x128xf32> to vector<8x32xf32>
    %226 = vector.extract_strided_slice %223 {offsets = [0, 32], sizes = [8, 32], strides = [1, 1]} : vector<8x128xf32> to vector<8x32xf32>
    %227 = vector.extract_strided_slice %224 {offsets = [0, 64], sizes = [8, 32], strides = [1, 1]} : vector<8x128xf32> to vector<8x32xf32>
    %228 = vector.extract_strided_slice %223 {offsets = [0, 96], sizes = [8, 32], strides = [1, 1]} : vector<8x128xf32> to vector<8x32xf32>
    %229 = arith.mulf %226, %193 : vector<8x32xf32>
    %230 = arith.mulf %225, %227 : vector<8x32xf32>
    %231 = arith.addf %229, %230 : vector<8x32xf32>
    %232 = math.tanh %231 : vector<8x32xf32>
    %233 = arith.mulf %228, %232 : vector<8x32xf32>
    %c6_i32 = arith.constant 6 : i32
    %234 = arith.index_cast %c6_i32 : i32 to index
    %c0_41 = arith.constant 0 : index
    %c0_42 = arith.constant 0 : index
    %235 = vector.load %arg0[%234, %c0_41, %c0_42] : memref<8x8x128xf32, #tpu.memory_space<vmem>>, vector<1x8x128xf32>
    %236 = vector.shape_cast %235 : vector<1x8x128xf32> to vector<8x128xf32>
    %cst_43 = arith.constant dense<0.000000e+00> : vector<8x128xf32>
    %237 = tpu.matmul %215, %0, %cst_43 {dimension_numbers = #tpu.dot_dimension_numbers<[1], [0], [0], [1], [0, 0, 1, 1], [], []>} : vector<8x32xf32>, vector<32x128xf32>, vector<8x128xf32> -> vector<8x128xf32>
    %238 = arith.addf %236, %237 : vector<8x128xf32>
    %239 = arith.negf %238 : vector<8x128xf32>
    %240 = math.exp %239 : vector<8x128xf32>
    %cst_44 = arith.constant 1.000000e+00 : f32
    %241 = vector.broadcast %cst_44 : f32 to vector<8x128xf32>
    %242 = arith.addf %241, %240 : vector<8x128xf32>
    %243 = arith.divf %241, %242 : vector<8x128xf32>
    %244 = math.tanh %238 : vector<8x128xf32>
    %245 = vector.extract_strided_slice %243 {offsets = [0, 0], sizes = [8, 32], strides = [1, 1]} : vector<8x128xf32> to vector<8x32xf32>
    %246 = vector.extract_strided_slice %243 {offsets = [0, 32], sizes = [8, 32], strides = [1, 1]} : vector<8x128xf32> to vector<8x32xf32>
    %247 = vector.extract_strided_slice %244 {offsets = [0, 64], sizes = [8, 32], strides = [1, 1]} : vector<8x128xf32> to vector<8x32xf32>
    %248 = vector.extract_strided_slice %243 {offsets = [0, 96], sizes = [8, 32], strides = [1, 1]} : vector<8x128xf32> to vector<8x32xf32>
    %249 = arith.mulf %246, %213 : vector<8x32xf32>
    %250 = arith.mulf %245, %247 : vector<8x32xf32>
    %251 = arith.addf %249, %250 : vector<8x32xf32>
    %252 = math.tanh %251 : vector<8x32xf32>
    %253 = arith.mulf %248, %252 : vector<8x32xf32>
    %254 = tpu.concatenate %253, %233 in 1 : vector<8x32xf32>, vector<8x32xf32> -> vector<8x64xf32>
    %cst_45 = arith.constant dense<0.000000e+00> : vector<8x128xf32>
    %255 = tpu.matmul %254, %1, %cst_45 {dimension_numbers = #tpu.dot_dimension_numbers<[1], [0], [0], [1], [0, 0, 1, 1], [], []>} : vector<8x64xf32>, vector<64x128xf32>, vector<8x128xf32> -> vector<8x128xf32>
    %256 = arith.addf %255, %4 : vector<8x128xf32>
    %257 = arith.negf %256 : vector<8x128xf32>
    %258 = math.exp %257 : vector<8x128xf32>
    %cst_46 = arith.constant 1.000000e+00 : f32
    %259 = vector.broadcast %cst_46 : f32 to vector<8x128xf32>
    %260 = arith.addf %259, %258 : vector<8x128xf32>
    %261 = arith.divf %259, %260 : vector<8x128xf32>
    %262 = math.tanh %256 : vector<8x128xf32>
    %263 = vector.extract_strided_slice %261 {offsets = [0, 0], sizes = [8, 32], strides = [1, 1]} : vector<8x128xf32> to vector<8x32xf32>
    %264 = vector.extract_strided_slice %261 {offsets = [0, 32], sizes = [8, 32], strides = [1, 1]} : vector<8x128xf32> to vector<8x32xf32>
    %265 = vector.extract_strided_slice %262 {offsets = [0, 64], sizes = [8, 32], strides = [1, 1]} : vector<8x128xf32> to vector<8x32xf32>
    %266 = vector.extract_strided_slice %261 {offsets = [0, 96], sizes = [8, 32], strides = [1, 1]} : vector<8x128xf32> to vector<8x32xf32>
    %267 = arith.mulf %264, %231 : vector<8x32xf32>
    %268 = arith.mulf %263, %265 : vector<8x32xf32>
    %269 = arith.addf %267, %268 : vector<8x32xf32>
    %270 = math.tanh %269 : vector<8x32xf32>
    %271 = arith.mulf %266, %270 : vector<8x32xf32>
    %c7_i32 = arith.constant 7 : i32
    %272 = arith.index_cast %c7_i32 : i32 to index
    %c0_47 = arith.constant 0 : index
    %c0_48 = arith.constant 0 : index
    %273 = vector.load %arg0[%272, %c0_47, %c0_48] : memref<8x8x128xf32, #tpu.memory_space<vmem>>, vector<1x8x128xf32>
    %274 = vector.shape_cast %273 : vector<1x8x128xf32> to vector<8x128xf32>
    %cst_49 = arith.constant dense<0.000000e+00> : vector<8x128xf32>
    %275 = tpu.matmul %253, %0, %cst_49 {dimension_numbers = #tpu.dot_dimension_numbers<[1], [0], [0], [1], [0, 0, 1, 1], [], []>} : vector<8x32xf32>, vector<32x128xf32>, vector<8x128xf32> -> vector<8x128xf32>
    %276 = arith.addf %274, %275 : vector<8x128xf32>
    %277 = arith.negf %276 : vector<8x128xf32>
    %278 = math.exp %277 : vector<8x128xf32>
    %cst_50 = arith.constant 1.000000e+00 : f32
    %279 = vector.broadcast %cst_50 : f32 to vector<8x128xf32>
    %280 = arith.addf %279, %278 : vector<8x128xf32>
    %281 = arith.divf %279, %280 : vector<8x128xf32>
    %282 = math.tanh %276 : vector<8x128xf32>
    %283 = vector.extract_strided_slice %281 {offsets = [0, 0], sizes = [8, 32], strides = [1, 1]} : vector<8x128xf32> to vector<8x32xf32>
    %284 = vector.extract_strided_slice %281 {offsets = [0, 32], sizes = [8, 32], strides = [1, 1]} : vector<8x128xf32> to vector<8x32xf32>
    %285 = vector.extract_strided_slice %282 {offsets = [0, 64], sizes = [8, 32], strides = [1, 1]} : vector<8x128xf32> to vector<8x32xf32>
    %286 = vector.extract_strided_slice %281 {offsets = [0, 96], sizes = [8, 32], strides = [1, 1]} : vector<8x128xf32> to vector<8x32xf32>
    %287 = arith.mulf %284, %251 : vector<8x32xf32>
    %288 = arith.mulf %283, %285 : vector<8x32xf32>
    %289 = arith.addf %287, %288 : vector<8x32xf32>
    %290 = math.tanh %289 : vector<8x32xf32>
    %291 = arith.mulf %286, %290 : vector<8x32xf32>
    %292 = tpu.concatenate %291, %271 in 1 : vector<8x32xf32>, vector<8x32xf32> -> vector<8x64xf32>
    %cst_51 = arith.constant dense<0.000000e+00> : vector<8x128xf32>
    %293 = tpu.matmul %292, %1, %cst_51 {dimension_numbers = #tpu.dot_dimension_numbers<[1], [0], [0], [1], [0, 0, 1, 1], [], []>} : vector<8x64xf32>, vector<64x128xf32>, vector<8x128xf32> -> vector<8x128xf32>
    %294 = arith.addf %293, %4 : vector<8x128xf32>
    %295 = arith.negf %294 : vector<8x128xf32>
    %296 = math.exp %295 : vector<8x128xf32>
    %cst_52 = arith.constant 1.000000e+00 : f32
    %297 = vector.broadcast %cst_52 : f32 to vector<8x128xf32>
    %298 = arith.addf %297, %296 : vector<8x128xf32>
    %299 = arith.divf %297, %298 : vector<8x128xf32>
    %300 = math.tanh %294 : vector<8x128xf32>
    %301 = vector.extract_strided_slice %299 {offsets = [0, 0], sizes = [8, 32], strides = [1, 1]} : vector<8x128xf32> to vector<8x32xf32>
    %302 = vector.extract_strided_slice %299 {offsets = [0, 32], sizes = [8, 32], strides = [1, 1]} : vector<8x128xf32> to vector<8x32xf32>
    %303 = vector.extract_strided_slice %300 {offsets = [0, 64], sizes = [8, 32], strides = [1, 1]} : vector<8x128xf32> to vector<8x32xf32>
    %304 = vector.extract_strided_slice %299 {offsets = [0, 96], sizes = [8, 32], strides = [1, 1]} : vector<8x128xf32> to vector<8x32xf32>
    %305 = arith.mulf %302, %269 : vector<8x32xf32>
    %306 = arith.mulf %301, %303 : vector<8x32xf32>
    %307 = arith.addf %305, %306 : vector<8x32xf32>
    %308 = math.tanh %307 : vector<8x32xf32>
    %309 = arith.mulf %304, %308 : vector<8x32xf32>
    %c8_i32 = arith.constant 8 : i32
    %c0_53 = arith.constant 0 : index
    %c0_54 = arith.constant 0 : index
    %310 = vector.load %arg4[%c0_53, %c0_54] : memref<32x20xf32, #tpu.memory_space<vmem>>, vector<32x20xf32>
    %cst_55 = arith.constant dense<0.000000e+00> : vector<8x20xf32>
    %311 = tpu.matmul %309, %310, %cst_55 {dimension_numbers = #tpu.dot_dimension_numbers<[1], [0], [0], [1], [0, 0, 1, 1], [], []>} : vector<8x32xf32>, vector<32x20xf32>, vector<8x20xf32> -> vector<8x20xf32>
    %c0_56 = arith.constant 0 : index
    %c0_57 = arith.constant 0 : index
    %312 = vector.load %arg5[%c0_56, %c0_57] : memref<1x20xf32, #tpu.memory_space<vmem>>, vector<1x20xf32>
    %313 = vector.broadcast %312 : vector<1x20xf32> to vector<8x20xf32>
    %314 = arith.addf %311, %313 : vector<8x20xf32>
    %cst_58 = arith.constant dense<0xFF800000> : vector<8xf32>
    %315 = vector.multi_reduction <maximumf>, %314, %cst_58 [1] : vector<8x20xf32> to vector<8xf32>
    %316 = vector.shape_cast %315 : vector<8xf32> to vector<8x1xf32>
    %317 = vector.broadcast %316 : vector<8x1xf32> to vector<8x20xf32>
    %318 = arith.subf %314, %317 : vector<8x20xf32>
    %319 = math.exp %318 : vector<8x20xf32>
    %cst_59 = arith.constant dense<0.000000e+00> : vector<8xf32>
    %320 = vector.multi_reduction <add>, %319, %cst_59 [1] : vector<8x20xf32> to vector<8xf32>
    %321 = vector.shape_cast %320 : vector<8xf32> to vector<8x1xf32>
    %322 = math.log %321 : vector<8x1xf32>
    %323 = arith.addf %322, %316 : vector<8x1xf32>
    %324 = vector.broadcast %323 : vector<8x1xf32> to vector<8x20xf32>
    %325 = arith.subf %314, %324 : vector<8x20xf32>
    %c0_60 = arith.constant 0 : index
    %c0_61 = arith.constant 0 : index
    %326 = vector.load %arg6[%c0_60, %c0_61] : memref<8x20xf32, #tpu.memory_space<vmem>>, vector<8x20xf32>
    tpu.vector_store %arg6[%c0_60, %c0_61], %325 {strides = array<i32>} : memref<8x20xf32, #tpu.memory_space<vmem>>, vector<8x20xf32>,
    return
  }
}

</mosaic_0001>

<bundles_post_ra>
// kernel: tpu_custom_call.1
= control target key start
LH: loop header
LB: loop body
LE: loop exit
PB: predicated region body
PF: predicated region fallthrough
CT: control target
= control target key end

     0   :  { %11 = vsyncpa [#allocation3], 0  ;;  %s1797_s0 = inlined_call_operand.hbm [shape: f32[8,8,128], index: 0, kind: input, shape index: {}]   ;;  %s1798_s1 = inlined_call_operand.vmem [shape: f32[32,128], index: 1, kind: input, shape index: {}]   ;;  %s1799_s2 = inlined_call_operand.hbm [shape: f32[64,128], index: 2, kind: input, shape index: {}]   ;;  %s1800_s3 = inlined_call_operand.vmem [shape: f32[1,128], index: 3, kind: input, shape index: {}]   ;;  %s1801_s4 = inlined_call_operand.vmem [shape: f32[32,20], index: 4, kind: input, shape index: {}]   ;;  %s1802_s5 = inlined_call_operand.vmem [shape: f32[1,20], index: 5, kind: input, shape index: {}]   ;;  %s1803_s6 = inlined_call_operand.hbm [shape: f32[8,20], index: 6, kind: output, shape index: {}]  }
   0x1   :  { %12 = vsyncpa [#allocation6], 0 }
   0x2   :  { %13 = vsyncpa [#allocation4], 0  ;;  %s18_s23 = sshll.u32 %s1797_s0, 4  ;;  %s1437_s24 = smov [#allocation2]   ;;  %s19_s23 = int_to_ptr.hbm [resolvable:$true] %s18_s23 }
   0x3   :  { %s20_s25 = sshll.u32 %s1437_s24, 4  ;;  %s33_s28 = sshll.u32 %s1799_s2, 4  ;;  %s21_s25 = int_to_ptr.vmem [resolvable:$true] %s20_s25  ;;  %s34_s28 = int_to_ptr.hbm [resolvable:$true] %s33_s28 }
   0x4   :  { %s1438_s29 = smov 128   ;;  %s1439_s30 = smov 8  }
   0x5   :  { %26 = dma.hbm_to_vmem [thread:$0]  %s19_s23, 1024, %s21_s25, [#allocation3], %s1438_s29, %s1438_s29, %s1439_s30  }
   0x6   :  { %s1440_s7 = smov [#allocation5]  }
   0x7   :  { %s35_s8 = sshll.u32 %s1440_s7, 4  ;;  %s36_s8 = int_to_ptr.vmem [resolvable:$true] %s35_s8 }
   0x8   :  { %41 = dma.hbm_to_vmem [thread:$0]  %s34_s28, 1024, %s36_s8, [#allocation6], %s1438_s29, %s1438_s29, %s1439_s30  }
   0x9   :  { %1431 = dma.done.wait [#allocation3], 1024  }
   0xa   :  { %1432 = vsyncadd [#allocation3], 4294966272 }
   0xb   :  { %1433 = dma.done.wait [#allocation6], 1024  }
   0xc   :  { %1434 = vsyncadd [#allocation6], 4294966272  ;;  %v1489_v0 = vld [vmem:[%s1798_s1 + $0x18] sm:$0xff]  ;;  %v1494_v1 = vld [vmem:[%s1798_s1 + $0x10] sm:$0xff]  ;;  %v1441_v4 = vmov 0.0   ;;  %s1443_s15 = smov 32  }
   0xd   :  { %89 = vmatpush.msra.mxu0 %v1489_v0  ;;  %217 = vmatpush.msra.mxu2 %v1489_v0  ;;  %v1501_v2 = vld [vmem:[%s1798_s1 + $0x8] sm:$0xff]  ;;  %v1508_v3 = vld [vmem:[%s1798_s1] sm:$0xff]  ;;  %s1442_s1 = smov 64   ;;  %v1528_v28 = vld [vmem:[#allocation5 + $0x38] sm:$0xff]  ;;  %vm73_vm4 = vcmask 261120   ;;  %vm140_vm5 = vcmask 523264  }
   0xe   :  { %v72_v5 = vld [vmem:[#allocation2] sm:$0xff]  ;;  %v1530_v29 = vld [vmem:[#allocation5 + $0x30] sm:$0xff]  ;;  %152 = vmatpush.msra.mxu1 %v1528_v28  ;;  %283 = vmatpush.msra.mxu3 %v1528_v28  ;;  %v1534_v30 = vld [vmem:[#allocation5 + $0x28] sm:$0xff]  ;;  %s1173_s7 = sshll.u32 %s1803_s6, 4  ;;  %s1174_s7 = int_to_ptr.hbm [resolvable:$true] %s1173_s7 }
   0xf   :  { %90 = vmatpush.msra.mxu0 %v1494_v1  ;;  %218 = vmatpush.msra.mxu2 %v1494_v1  ;;  %v1539_v31 = vld [vmem:[#allocation5 + $0x20] sm:$0xff]  ;;  %v1544_v32 = vld [vmem:[#allocation5 + $0x18] sm:$0xff]  ;;  %v1549_v33 = vld [vmem:[#allocation5 + $0x10] sm:$0xff] }
  0x10   :  { %153 = vmatpush.msra.mxu1 %v1530_v29  ;;  %284 = vmatpush.msra.mxu3 %v1530_v29  ;;  %v1554_v34 = vld [vmem:[#allocation5 + $0x8] sm:$0xff]  ;;  %v1564_v37 = vld [vmem:[#allocation5] sm:$0xff] }
  0x11   :  { %91 = vmatpush.msra.mxu0 %v1501_v2  ;;  %219 = vmatpush.msra.mxu2 %v1501_v2  ;;  %v1595_v40 = vld [vmem:[%s1800_s3] ss:$0 sm:$0xff]  ;;  %v202_v43 = vld [vmem:[#allocation2 + $0x8] sm:$0xff] }
  0x12   :  { %154 = vmatpush.msra.mxu1 %v1534_v30  ;;  %285 = vmatpush.msra.mxu3 %v1534_v30 }
  0x13   :  { %92 = vmatpush.msra.mxu0 %v1508_v3  ;;  %220 = vmatpush.msra.mxu2 %v1508_v3 }
  0x14   :  { %93 = vmatmul.f32.vlgmr.msra.gmra.mxu0 %v1441_v4  ;;  %155 = vmatpush.msra.mxu1 %v1539_v31 }
  0x15   :  { %348 = vmatpush.msrb.mxu0 %v1489_v0  ;;  %414 = vmatpush.msrb.mxu2 %v1528_v28 }
  0x16   :  { %286 = vmatpush.msra.mxu3 %v1539_v31  ;;  %156 = vmatpush.msra.mxu1 %v1544_v32 }
  0x17   :  { %349 = vmatpush.msrb.mxu0 %v1494_v1  ;;  %415 = vmatpush.msrb.mxu2 %v1530_v29 }
  0x18   :  { %287 = vmatpush.msra.mxu3 %v1544_v32  ;;  %157 = vmatpush.msra.mxu1 %v1549_v33 }
  0x19   :  { %350 = vmatpush.msrb.mxu0 %v1501_v2  ;;  %416 = vmatpush.msrb.mxu2 %v1534_v30 }
  0x1a   :  { %288 = vmatpush.msra.mxu3 %v1549_v33  ;;  %158 = vmatpush.msra.mxu1 %v1554_v34 }
  0x1b   :  { %351 = vmatpush.msrb.mxu0 %v1508_v3  ;;  %417 = vmatpush.msrb.mxu2 %v1539_v31 }
  0x1c   :  { %289 = vmatpush.msra.mxu3 %v1554_v34  ;;  %159 = vmatpush.msra.mxu1 %v1564_v37 }
  0x1d   :  { %479 = vmatpush.msra.mxu0 %v1489_v0  ;;  %418 = vmatpush.msrb.mxu2 %v1544_v32 }
  0x1e   :  { %290 = vmatpush.msra.mxu3 %v1564_v37  ;;  %545 = vmatpush.msrb.mxu1 %v1528_v28 }
  0x1f   :  { %480 = vmatpush.msra.mxu0 %v1494_v1  ;;  %419 = vmatpush.msrb.mxu2 %v1549_v33 }
  0x20   :  { %610 = vmatpush.msrb.mxu3 %v1489_v0  ;;  %546 = vmatpush.msrb.mxu1 %v1530_v29 }
  0x21   :  { %481 = vmatpush.msra.mxu0 %v1501_v2  ;;  %420 = vmatpush.msrb.mxu2 %v1554_v34 }
  0x22   :  { %611 = vmatpush.msrb.mxu3 %v1494_v1  ;;  %547 = vmatpush.msrb.mxu1 %v1534_v30 }
  0x23   :  { %482 = vmatpush.msra.mxu0 %v1508_v3  ;;  %421 = vmatpush.msrb.mxu2 %v1564_v37 }
  0x24   :  { %612 = vmatpush.msrb.mxu3 %v1501_v2  ;;  %548 = vmatpush.msrb.mxu1 %v1539_v31 }
  0x26   :  { %613 = vmatpush.msrb.mxu3 %v1508_v3  ;;  %549 = vmatpush.msrb.mxu1 %v1544_v32 }
  0x28   :  { %550 = vmatpush.msrb.mxu1 %v1549_v33 }
  0x2a   :  { %551 = vmatpush.msrb.mxu1 %v1554_v34 }
  0x2c   :  { %552 = vmatpush.msrb.mxu1 %v1564_v37 }
  0x91   :  { %v94_v6 = vpop.f32.mrf.mxu0 }
  0x92   :  { %v97_v7 = vadd.f32 %v94_v6, %v72_v5 }
  0x94   :  { %1226 = vtanh.f32 %v97_v7  ;;  %v1184_v9 = vmul.f32 -1.442695, %v97_v7 }
  0x96   :  { %1228 = vpow2.f32 %v1184_v9 }
  0x9a   :  { %v1227_v8 = vpop.eup %1226 }
  0x9b   :  { %120 = vrot.lane.b32.xlu0 %v1227_v8, %s1442_s1 }
  0x9c   :  { %v1229_v10 = vpop.eup %1228 }
  0x9d   :  { %v101_v11 = vadd.f32 1.0, %v1229_v10 }
  0x9f   :  { %1230 = vrcp.f32 %v101_v11  ;;  %v113_v17 = vand.u32 2147483648, %v101_v11  ;;  %vm107_vm1 = vweird.f32 %v101_v11  ;;  %v111_v18 = vand.u32 2147483647, %v101_v11 }
  0xa1   :  { %v114_v20 = vor.u32 1.1754944e-38, %v113_v17  ;;  %vm112_vm3 = vcmp.eq.f32.partialorder %v111_v18, 8.507059e+37 }
  0xa5   :  { %v1231_v12 = vpop.eup %1230 }
  0xa6   :  { %v103_v13 = vmul.f32 %v1231_v12, %v101_v11  ;;  %vm108_vm0 = vweird.f32 %v1231_v12 }
  0xa7   :  { %vm109_vm2 = vmor %vm107_vm1, %vm108_vm0 }
  0xa8   :  { %v104_v14 = vsub.f32 1.0, %v103_v13 }
  0xaa   :  { %v105_v15 = vmul.f32 %v1231_v12, %v104_v14 }
  0xac   :  { %v106_v16 = vadd.f32 %v1231_v12, %v105_v15 }
  0xae   :  { %v110_v19 = vsel %vm109_vm2, %v1231_v12, %v106_v16 }
  0xaf   :  { %v115_v22 = vsel %vm112_vm3, %v114_v20, %v110_v19 }
  0xb0   :  { %v118_v24 = vmul.f32 0.0, %v115_v22 }
 0x10d   :  { %v121_v21 = vpop.permute.xlu0 %120 }
 0x10e   :  { %v123_v23 = vmul.f32 %v121_v21, %v115_v22 }
 0x110   :  { %125 = vrot.lane.b32.xlu0 %v123_v23, %s1443_s15 }
 0x182   :  { %v126_v25 = vpop.permute.xlu0 %125 }
 0x183   :  { %v1524_v26 = vadd.f32 %v126_v25, %v118_v24 }
 0x185   :  { %1232 = vtanh.f32 %v1524_v26 }
 0x18b   :  { %v1233_v27 = vpop.eup %1232 }
 0x18c   :  { %131 = vrot.lane.b32.xlu1 %v1233_v27, %s1442_s1 }
 0x1fe   :  { %v132_v35 = vpop.permute.xlu1 %131 }
 0x1ff   :  { %v134_v36 = vmul.f32 %v132_v35, %v115_v22 }
 0x201   :  { %136 = vrot.lane.b32.xlu1 %v134_v36, %s1443_s15 }
 0x273   :  { %v137_v38 = vpop.permute.xlu1 %136 }
 0x274   :  { %1187 = vmatmul.msk.f32.vlgmr.msra.gmra.mxu2 %vm73_vm4, %v137_v38  ;;  %v139_v39 = vsel %vm73_vm4, %v137_v38, 0.0 }
 0x275   :  { %1185 = vmatmul.msk.f32.vlgmr.msra.gmra.mxu1 %vm140_vm5, %v139_v39  ;;  %741 = vmatpush.msra.mxu2 %v1489_v0 }
 0x276   :  { %872 = vmatpush.msra.mxu1 %v1489_v0 }
 0x277   :  { %742 = vmatpush.msra.mxu2 %v1494_v1 }
 0x278   :  { %873 = vmatpush.msra.mxu1 %v1494_v1 }
 0x279   :  { %743 = vmatpush.msra.mxu2 %v1501_v2 }
 0x27a   :  { %874 = vmatpush.msra.mxu1 %v1501_v2 }
 0x27b   :  { %744 = vmatpush.msra.mxu2 %v1508_v3 }
 0x27c   :  { %875 = vmatpush.msra.mxu1 %v1508_v3 }
 0x2f2   :  { %v161_v41 = vpop.f32.mrf.mxu1 }
 0x2f3   :  { %v162_v42 = vadd.f32 %v1595_v40, %v161_v41 }
 0x2f5   :  { %1234 = vtanh.f32 %v162_v42  ;;  %v1186_v48 = vmul.f32 -1.442695, %v162_v42  ;;  %v333_v42 = vld [vmem:[#allocation2 + $0x10] sm:$0xff] }
 0x2f7   :  { %v222_v44 = vpop.f32.mrf.mxu2 }
 0x2f8   :  { %v225_v45 = vadd.f32 %v222_v44, %v202_v43 }
 0x2fa   :  { %1236 = vtanh.f32 %v225_v45  ;;  %v1188_v49 = vmul.f32 -1.442695, %v225_v45 }
 0x2fb   :  { %v1235_v46 = vpop.eup %1234  ;;  %1238 = vpow2.f32 %v1186_v48 }
 0x2fc   :  { %186 = vrot.lane.b32.xlu2 %v1235_v46, %s1442_s1  ;;  %1240 = vpow2.f32 %v1188_v49 }
 0x300   :  { %v1237_v47 = vpop.eup %1236 }
 0x301   :  { %v1239_v50 = vpop.eup %1238 }
 0x302   :  { %v167_v51 = vadd.f32 1.0, %v1239_v50  ;;  %v1241_v52 = vpop.eup %1240 }
 0x303   :  { %v229_v53 = vadd.f32 1.0, %v1241_v52 }
 0x304   :  { %248 = vrot.lane.b32.xlu2 %v1237_v47, %s1442_s1  ;;  %1242 = vrcp.f32 %v167_v51  ;;  %v179_v62 = vand.u32 2147483648, %v167_v51  ;;  %vm173_vm7 = vweird.f32 %v167_v51  ;;  %v177_v63 = vand.u32 2147483647, %v167_v51 }
 0x305   :  { %1244 = vrcp.f32 %v229_v53  ;;  %v241_v11 = vand.u32 2147483648, %v229_v53  ;;  %vm235_vm11 = vweird.f32 %v229_v53  ;;  %v239_v12 = vand.u32 2147483647, %v229_v53 }
 0x306   :  { %v180_v6 = vor.u32 1.1754944e-38, %v179_v62  ;;  %vm178_vm9 = vcmp.eq.f32.partialorder %v177_v63, 8.507059e+37 }
 0x307   :  { %v242_v14 = vor.u32 1.1754944e-38, %v241_v11  ;;  %vm240_vm13 = vcmp.eq.f32.partialorder %v239_v12, 8.507059e+37 }
 0x30a   :  { %v1243_v54 = vpop.eup %1242 }
 0x30b   :  { %v169_v55 = vmul.f32 %v1243_v54, %v167_v51  ;;  %v1245_v57 = vpop.eup %1244  ;;  %vm174_vm6 = vweird.f32 %v1243_v54 }
 0x30c   :  { %v231_v59 = vmul.f32 %v1245_v57, %v229_v53  ;;  %vm175_vm8 = vmor %vm173_vm7, %vm174_vm6  ;;  %vm236_vm10 = vweird.f32 %v1245_v57 }
 0x30d   :  { %v170_v56 = vsub.f32 1.0, %v169_v55  ;;  %vm237_vm12 = vmor %vm235_vm11, %vm236_vm10 }
 0x30e   :  { %v232_v61 = vsub.f32 1.0, %v231_v59 }
 0x30f   :  { %v171_v58 = vmul.f32 %v1243_v54, %v170_v56 }
 0x310   :  { %v233_v5 = vmul.f32 %v1245_v57, %v232_v61 }
 0x311   :  { %v172_v60 = vadd.f32 %v1243_v54, %v171_v58 }
 0x312   :  { %v234_v10 = vadd.f32 %v1245_v57, %v233_v5 }
 0x313   :  { %v176_v4 = vsel %vm175_vm8, %v1243_v54, %v172_v60 }
 0x314   :  { %v181_v8 = vsel %vm178_vm9, %v180_v6, %v176_v4  ;;  %v238_v13 = vsel %vm237_vm12, %v1245_v57, %v234_v10 }
 0x315   :  { %v243_v15 = vsel %vm240_vm13, %v242_v14, %v238_v13  ;;  %v184_v18 = vmul.f32 0.0, %v181_v8 }
 0x316   :  { %v246_v21 = vmul.f32 %v243_v15, %v1524_v26 }
 0x356   :  { %v187_v7 = vpop.permute.xlu2 %186 }
 0x357   :  { %v189_v9 = vmul.f32 %v187_v7, %v181_v8 }
 0x359   :  { %191 = vrot.lane.b32.xlu0 %v189_v9, %s1443_s15 }
 0x35e   :  { %v249_v16 = vpop.permute.xlu2 %248 }
 0x35f   :  { %v251_v17 = vmul.f32 %v249_v16, %v243_v15 }
 0x361   :  { %253 = vrot.lane.b32.xlu1 %v251_v17, %s1443_s15 }
 0x3cb   :  { %v192_v19 = vpop.permute.xlu0 %191 }
 0x3cc   :  { %v1602_v20 = vadd.f32 %v192_v19, %v184_v18 }
 0x3ce   :  { %1246 = vtanh.f32 %v1602_v20 }
 0x3d3   :  { %v254_v22 = vpop.permute.xlu1 %253 }
 0x3d4   :  { %v1247_v23 = vpop.eup %1246  ;;  %v1606_v24 = vadd.f32 %v254_v22, %v246_v21 }
 0x3d5   :  { %197 = vrot.lane.b32.xlu2 %v1247_v23, %s1442_s1 }
 0x3d6   :  { %1248 = vtanh.f32 %v1606_v24 }
 0x3dc   :  { %v1249_v25 = vpop.eup %1248 }
 0x3dd   :  { %259 = vrot.lane.b32.xlu0 %v1249_v25, %s1442_s1 }
 0x42f   :  { %v198_v27 = vpop.permute.xlu2 %197 }
 0x430   :  { %v200_v35 = vmul.f32 %v198_v27, %v181_v8 }
 0x432   :  { %268 = vrot.lane.b32.xlu2 %v200_v35, %s1442_s1 }
 0x44f   :  { %v260_v36 = vpop.permute.xlu0 %259 }
 0x450   :  { %v262_v38 = vmul.f32 %v260_v36, %v243_v15 }
 0x452   :  { %264 = vrot.lane.b32.xlu1 %v262_v38, %s1443_s15 }
 0x48c   :  { %v269_v26 = vpop.permute.xlu2 %268 }
 0x4c4   :  { %v265_v39 = vpop.permute.xlu1 %264 }
 0x4c5   :  { %1191 = vmatmul.msk.f32.vlgmr.msrb.gmra.mxu0 %vm73_vm4, %v265_v39  ;;  %v271_v41 = vsel %vm73_vm4, %v265_v39, %v269_v26 }
 0x4c6   :  { %1189 = vmatmul.msk.f32.vlgmr.msra.gmra.mxu3 %vm140_vm5, %v271_v41  ;;  %676 = vmatpush.msrb.mxu0 %v1528_v28 }
 0x4c7   :  { %807 = vmatpush.msra.mxu3 %v1528_v28 }
 0x4c8   :  { %677 = vmatpush.msrb.mxu0 %v1530_v29 }
 0x4c9   :  { %808 = vmatpush.msra.mxu3 %v1530_v29 }
 0x4ca   :  { %678 = vmatpush.msrb.mxu0 %v1534_v30 }
 0x4cb   :  { %809 = vmatpush.msra.mxu3 %v1534_v30 }
 0x4cc   :  { %679 = vmatpush.msrb.mxu0 %v1539_v31 }
 0x4cd   :  { %810 = vmatpush.msra.mxu3 %v1539_v31 }
 0x4ce   :  { %680 = vmatpush.msrb.mxu0 %v1544_v32 }
 0x4cf   :  { %811 = vmatpush.msra.mxu3 %v1544_v32 }
 0x4d0   :  { %681 = vmatpush.msrb.mxu0 %v1549_v33 }
 0x4d1   :  { %812 = vmatpush.msra.mxu3 %v1549_v33 }
 0x4d2   :  { %682 = vmatpush.msrb.mxu0 %v1554_v34 }
 0x4d3   :  { %813 = vmatpush.msra.mxu3 %v1554_v34 }
 0x4d4   :  { %683 = vmatpush.msrb.mxu0 %v1564_v37 }
 0x4d5   :  { %814 = vmatpush.msra.mxu3 %v1564_v37 }
 0x542   :  { %v353_v43 = vpop.f32.mrf.mxu0 }
 0x543   :  { %v356_v44 = vadd.f32 %v353_v43, %v333_v42 }
 0x545   :  { %1250 = vtanh.f32 %v356_v44  ;;  %v1192_v49 = vmul.f32 -1.442695, %v356_v44 }
 0x549   :  { %v292_v45 = vpop.f32.mrf.mxu3 }
 0x54a   :  { %v293_v46 = vadd.f32 %v1595_v40, %v292_v45 }
 0x54b   :  { %v1251_v47 = vpop.eup %1250 }
 0x54c   :  { %1252 = vtanh.f32 %v293_v46  ;;  %379 = vrot.lane.b32.xlu0 %v1251_v47, %s1442_s1  ;;  %v1190_v50 = vmul.f32 -1.442695, %v293_v46 }
 0x54d   :  { %1254 = vpow2.f32 %v1192_v49 }
 0x54e   :  { %1256 = vpow2.f32 %v1190_v50 }
 0x552   :  { %v1253_v48 = vpop.eup %1252 }
 0x553   :  { %317 = vrot.lane.b32.xlu1 %v1253_v48, %s1442_s1  ;;  %v1255_v51 = vpop.eup %1254 }
 0x554   :  { %v360_v52 = vadd.f32 1.0, %v1255_v51  ;;  %v1257_v53 = vpop.eup %1256 }
 0x555   :  { %v298_v54 = vadd.f32 1.0, %v1257_v53 }
 0x556   :  { %1258 = vrcp.f32 %v360_v52  ;;  %v372_v63 = vand.u32 2147483648, %v360_v52  ;;  %vm366_vm15 = vweird.f32 %v360_v52  ;;  %v370_v4 = vand.u32 2147483647, %v360_v52 }
 0x557   :  { %1260 = vrcp.f32 %v298_v54  ;;  %v310_v12 = vand.u32 2147483648, %v298_v54  ;;  %vm304_vm3 = vweird.f32 %v298_v54  ;;  %v308_v13 = vand.u32 2147483647, %v298_v54 }
 0x558   :  { %v373_v7 = vor.u32 1.1754944e-38, %v372_v63  ;;  %vm371_vm1 = vcmp.eq.f32.partialorder %v370_v4, 8.507059e+37 }
 0x559   :  { %v311_v15 = vor.u32 1.1754944e-38, %v310_v12  ;;  %vm309_vm7 = vcmp.eq.f32.partialorder %v308_v13, 8.507059e+37 }
 0x55c   :  { %v1259_v55 = vpop.eup %1258 }
 0x55d   :  { %v362_v56 = vmul.f32 %v1259_v55, %v360_v52  ;;  %v1261_v57 = vpop.eup %1260  ;;  %vm367_vm14 = vweird.f32 %v1259_v55 }
 0x55e   :  { %v300_v59 = vmul.f32 %v1261_v57, %v298_v54  ;;  %vm368_vm0 = vmor %vm366_vm15, %vm367_vm14  ;;  %vm305_vm2 = vweird.f32 %v1261_v57 }
 0x55f   :  { %v363_v58 = vsub.f32 1.0, %v362_v56  ;;  %vm306_vm6 = vmor %vm304_vm3, %vm305_vm2 }
 0x560   :  { %v301_v61 = vsub.f32 1.0, %v300_v59 }
 0x561   :  { %v364_v60 = vmul.f32 %v1259_v55, %v363_v58 }
 0x562   :  { %v302_v5 = vmul.f32 %v1261_v57, %v301_v61 }
 0x563   :  { %v365_v62 = vadd.f32 %v1259_v55, %v364_v60 }
 0x564   :  { %v303_v10 = vadd.f32 %v1261_v57, %v302_v5 }
 0x565   :  { %v369_v6 = vsel %vm368_vm0, %v1259_v55, %v365_v62 }
 0x566   :  { %v374_v9 = vsel %vm371_vm1, %v373_v7, %v369_v6  ;;  %v307_v14 = vsel %vm306_vm6, %v1261_v57, %v303_v10 }
 0x567   :  { %v312_v17 = vsel %vm309_vm7, %v311_v15, %v307_v14  ;;  %v377_v19 = vmul.f32 %v374_v9, %v1606_v24 }
 0x568   :  { %v315_v25 = vmul.f32 %v312_v17, %v1602_v20 }
 0x5be   :  { %v380_v8 = vpop.permute.xlu0 %379 }
 0x5bf   :  { %v382_v11 = vmul.f32 %v380_v8, %v374_v9 }
 0x5c1   :  { %384 = vrot.lane.b32.xlu2 %v382_v11, %s1443_s15 }
 0x5c5   :  { %v318_v16 = vpop.permute.xlu1 %317 }
 0x5c6   :  { %v320_v18 = vmul.f32 %v318_v16, %v312_v17 }
 0x5c8   :  { %322 = vrot.lane.b32.xlu0 %v320_v18, %s1443_s15 }
 0x61b   :  { %v385_v21 = vpop.permute.xlu2 %384 }
 0x61c   :  { %v1638_v22 = vadd.f32 %v385_v21, %v377_v19 }
 0x61e   :  { %1262 = vtanh.f32 %v1638_v22 }
 0x624   :  { %v1263_v23 = vpop.eup %1262 }
 0x625   :  { %390 = vrot.lane.b32.xlu1 %v1263_v23, %s1442_s1 }
 0x63a   :  { %v323_v27 = vpop.permute.xlu0 %322 }
 0x63b   :  { %v1643_v35 = vadd.f32 %v323_v27, %v315_v25 }
 0x63d   :  { %1264 = vtanh.f32 %v1643_v35 }
 0x643   :  { %v1265_v36 = vpop.eup %1264 }
 0x644   :  { %328 = vrot.lane.b32.xlu2 %v1265_v36, %s1442_s1 }
 0x697   :  { %v391_v38 = vpop.permute.xlu1 %390 }
 0x698   :  { %v393_v24 = vmul.f32 %v391_v38, %v374_v9 }
 0x69a   :  { %395 = vrot.lane.b32.xlu0 %v393_v24, %s1443_s15 }
 0x69e   :  { %v329_v26 = vpop.permute.xlu2 %328 }
 0x69f   :  { %v331_v39 = vmul.f32 %v329_v26, %v312_v17 }
 0x6a1   :  { %399 = vrot.lane.b32.xlu1 %v331_v39, %s1442_s1 }
 0x70c   :  { %v396_v41 = vpop.permute.xlu0 %395 }
 0x70d   :  { %1195 = vmatmul.msk.f32.vlgmr.msra.gmra.mxu0 %vm73_vm4, %v396_v41 }
 0x70e   :  { %1003 = vmatpush.msra.mxu0 %v1489_v0  ;;  %v464_v0 = vld [vmem:[#allocation2 + $0x18] sm:$0xff] }
 0x710   :  { %1004 = vmatpush.msra.mxu0 %v1494_v1 }
 0x712   :  { %1005 = vmatpush.msra.mxu0 %v1501_v2 }
 0x713   :  { %v400_v20 = vpop.permute.xlu1 %399 }
 0x714   :  { %v402_v42 = vsel %vm73_vm4, %v396_v41, %v400_v20  ;;  %1006 = vmatpush.msra.mxu0 %v1508_v3  ;;  %v595_v41 = vld [vmem:[#allocation2 + $0x20] sm:$0xff] }
 0x715   :  { %1193 = vmatmul.msk.f32.vlgmr.msrb.gmra.mxu2 %vm140_vm5, %v402_v42 }
 0x716   :  { %938 = vmatpush.msrb.mxu2 %v1528_v28 }
 0x718   :  { %939 = vmatpush.msrb.mxu2 %v1530_v29 }
 0x71a   :  { %940 = vmatpush.msrb.mxu2 %v1534_v30 }
 0x71c   :  { %941 = vmatpush.msrb.mxu2 %v1539_v31 }
 0x71e   :  { %942 = vmatpush.msrb.mxu2 %v1544_v32 }
 0x720   :  { %943 = vmatpush.msrb.mxu2 %v1549_v33 }
 0x722   :  { %944 = vmatpush.msrb.mxu2 %v1554_v34 }
 0x724   :  { %945 = vmatpush.msrb.mxu2 %v1564_v37 }
 0x78a   :  { %v484_v1 = vpop.f32.mrf.mxu0 }
 0x78b   :  { %v487_v2 = vadd.f32 %v484_v1, %v464_v0 }
 0x78d   :  { %1266 = vtanh.f32 %v487_v2  ;;  %v1196_v46 = vmul.f32 -1.442695, %v487_v2 }
 0x793   :  { %v1267_v3 = vpop.eup %1266 }
 0x794   :  { %510 = vrot.lane.b32.xlu2 %v1267_v3, %s1442_s1 }
 0x798   :  { %v423_v43 = vpop.f32.mrf.mxu2 }
 0x799   :  { %v424_v44 = vadd.f32 %v1595_v40, %v423_v43 }
 0x79b   :  { %1268 = vtanh.f32 %v424_v44  ;;  %v1194_v53 = vmul.f32 -1.442695, %v424_v44 }
 0x79c   :  { %1270 = vpow2.f32 %v1196_v46 }
 0x7a1   :  { %v1269_v45 = vpop.eup %1268 }
 0x7a2   :  { %448 = vrot.lane.b32.xlu0 %v1269_v45, %s1442_s1  ;;  %v1271_v47 = vpop.eup %1270 }
 0x7a3   :  { %v491_v48 = vadd.f32 1.0, %v1271_v47 }
 0x7a5   :  { %1272 = vrcp.f32 %v491_v48  ;;  %v503_v55 = vand.u32 2147483648, %v491_v48  ;;  %vm497_vm9 = vweird.f32 %v491_v48  ;;  %v501_v56 = vand.u32 2147483647, %v491_v48 }
 0x7a6   :  { %1274 = vpow2.f32 %v1194_v53 }
 0x7a7   :  { %v504_v58 = vor.u32 1.1754944e-38, %v503_v55  ;;  %vm502_vm11 = vcmp.eq.f32.partialorder %v501_v56, 8.507059e+37 }
 0x7ab   :  { %v1273_v49 = vpop.eup %1272 }
 0x7ac   :  { %v493_v50 = vmul.f32 %v1273_v49, %v491_v48  ;;  %vm498_vm8 = vweird.f32 %v1273_v49  ;;  %v1275_v62 = vpop.eup %1274 }
 0x7ad   :  { %vm499_vm10 = vmor %vm497_vm9, %vm498_vm8  ;;  %v429_v63 = vadd.f32 1.0, %v1275_v62 }
 0x7ae   :  { %v494_v51 = vsub.f32 1.0, %v493_v50 }
 0x7af   :  { %1276 = vrcp.f32 %v429_v63  ;;  %v441_v9 = vand.u32 2147483648, %v429_v63  ;;  %vm435_vm13 = vweird.f32 %v429_v63  ;;  %v439_v10 = vand.u32 2147483647, %v429_v63 }
 0x7b0   :  { %v495_v52 = vmul.f32 %v1273_v49, %v494_v51 }
 0x7b1   :  { %v442_v12 = vor.u32 1.1754944e-38, %v441_v9  ;;  %vm440_vm15 = vcmp.eq.f32.partialorder %v439_v10, 8.507059e+37 }
 0x7b2   :  { %v496_v54 = vadd.f32 %v1273_v49, %v495_v52 }
 0x7b4   :  { %v500_v57 = vsel %vm499_vm10, %v1273_v49, %v496_v54 }
 0x7b5   :  { %v505_v59 = vsel %vm502_vm11, %v504_v58, %v500_v57  ;;  %v1277_v4 = vpop.eup %1276 }
 0x7b6   :  { %v431_v5 = vmul.f32 %v1277_v4, %v429_v63  ;;  %vm436_vm12 = vweird.f32 %v1277_v4  ;;  %v508_v16 = vmul.f32 %v505_v59, %v1638_v22 }
 0x7b7   :  { %vm437_vm14 = vmor %vm435_vm13, %vm436_vm12 }
 0x7b8   :  { %v432_v6 = vsub.f32 1.0, %v431_v5 }
 0x7ba   :  { %v433_v7 = vmul.f32 %v1277_v4, %v432_v6 }
 0x7bc   :  { %v434_v8 = vadd.f32 %v1277_v4, %v433_v7 }
 0x7be   :  { %v438_v11 = vsel %vm437_vm14, %v1277_v4, %v434_v8 }
 0x7bf   :  { %v443_v14 = vsel %vm440_vm15, %v442_v12, %v438_v11 }
 0x7c0   :  { %v446_v21 = vmul.f32 %v443_v14, %v1643_v35 }
 0x7ee   :  { %v511_v60 = vpop.permute.xlu2 %510 }
 0x7ef   :  { %v513_v61 = vmul.f32 %v511_v60, %v505_v59 }
 0x7f1   :  { %515 = vrot.lane.b32.xlu1 %v513_v61, %s1443_s15 }
 0x814   :  { %v449_v13 = vpop.permute.xlu0 %448 }
 0x815   :  { %v451_v15 = vmul.f32 %v449_v13, %v443_v14 }
 0x817   :  { %453 = vrot.lane.b32.xlu2 %v451_v15, %s1443_s15 }
 0x863   :  { %v516_v17 = vpop.permute.xlu1 %515 }
 0x864   :  { %v1670_v18 = vadd.f32 %v516_v17, %v508_v16 }
 0x866   :  { %1278 = vtanh.f32 %v1670_v18 }
 0x86c   :  { %v1279_v19 = vpop.eup %1278 }
 0x86d   :  { %521 = vrot.lane.b32.xlu0 %v1279_v19, %s1442_s1 }
 0x871   :  { %v454_v23 = vpop.permute.xlu2 %453 }
 0x872   :  { %v1675_v25 = vadd.f32 %v454_v23, %v446_v21  ;;  %v726_v21 = vld [vmem:[#allocation2 + $0x28] sm:$0xff] }
 0x874   :  { %1280 = vtanh.f32 %v1675_v25 }
 0x87a   :  { %v1281_v27 = vpop.eup %1280 }
 0x87b   :  { %459 = vrot.lane.b32.xlu1 %v1281_v27, %s1442_s1 }
 0x8df   :  { %v522_v36 = vpop.permute.xlu0 %521 }
 0x8e0   :  { %v524_v22 = vmul.f32 %v522_v36, %v505_v59 }
 0x8e2   :  { %526 = vrot.lane.b32.xlu2 %v524_v22, %s1443_s15 }
 0x8ed   :  { %v460_v38 = vpop.permute.xlu1 %459 }
 0x8ee   :  { %v462_v24 = vmul.f32 %v460_v38, %v443_v14 }
 0x8f0   :  { %530 = vrot.lane.b32.xlu0 %v462_v24, %s1442_s1 }
 0x93c   :  { %v527_v26 = vpop.permute.xlu2 %526 }
 0x93d   :  { %1199 = vmatmul.msk.f32.vlgmr.msrb.gmra.mxu3 %vm73_vm4, %v527_v26 }
 0x962   :  { %v531_v35 = vpop.permute.xlu0 %530 }
 0x963   :  { %v533_v39 = vsel %vm73_vm4, %v527_v26, %v531_v35 }
 0x964   :  { %1197 = vmatmul.msk.f32.vlgmr.msrb.gmra.mxu1 %vm140_vm5, %v533_v39 }
 0x965   :  { %1069 = vmatpush.msrb.mxu1 %v1528_v28 }
 0x967   :  { %1070 = vmatpush.msrb.mxu1 %v1530_v29 }
 0x969   :  { %1071 = vmatpush.msrb.mxu1 %v1534_v30 }
 0x96b   :  { %1072 = vmatpush.msrb.mxu1 %v1539_v31 }
 0x96d   :  { %1073 = vmatpush.msrb.mxu1 %v1544_v32 }
 0x96f   :  { %1074 = vmatpush.msrb.mxu1 %v1549_v33 }
 0x971   :  { %1075 = vmatpush.msrb.mxu1 %v1554_v34 }
 0x973   :  { %1076 = vmatpush.msrb.mxu1 %v1564_v37 }
 0x9c0   :  { %v615_v20 = vpop.f32.mrf.mxu3 }
 0x9c1   :  { %v618_v42 = vadd.f32 %v615_v20, %v595_v41 }
 0x9c3   :  { %1282 = vtanh.f32 %v618_v42  ;;  %v1200_v31 = vmul.f32 -1.442695, %v618_v42 }
 0x9c9   :  { %v1283_v0 = vpop.eup %1282 }
 0x9ca   :  { %641 = vrot.lane.b32.xlu1 %v1283_v0, %s1442_s1 }
 0x9e1   :  { %v554_v28 = vpop.f32.mrf.mxu1 }
 0x9e2   :  { %v555_v29 = vadd.f32 %v1595_v40, %v554_v28 }
 0x9e4   :  { %1284 = vtanh.f32 %v555_v29  ;;  %v1198_v32 = vmul.f32 -1.442695, %v555_v29 }
 0x9e5   :  { %1286 = vpow2.f32 %v1200_v31 }
 0x9e6   :  { %1288 = vpow2.f32 %v1198_v32 }
 0x9ea   :  { %v1285_v30 = vpop.eup %1284 }
 0x9eb   :  { %579 = vrot.lane.b32.xlu2 %v1285_v30, %s1442_s1  ;;  %v1287_v33 = vpop.eup %1286 }
 0x9ec   :  { %v622_v34 = vadd.f32 1.0, %v1287_v33  ;;  %v1289_v37 = vpop.eup %1288 }
 0x9ed   :  { %v560_v1 = vadd.f32 1.0, %v1289_v37 }
 0x9ee   :  { %1290 = vrcp.f32 %v622_v34  ;;  %v634_v48 = vand.u32 2147483648, %v622_v34  ;;  %vm628_vm1 = vweird.f32 %v622_v34  ;;  %v632_v50 = vand.u32 2147483647, %v622_v34 }
 0x9ef   :  { %1292 = vrcp.f32 %v560_v1  ;;  %v572_v58 = vand.u32 2147483648, %v560_v1  ;;  %vm566_vm7 = vweird.f32 %v560_v1  ;;  %v570_v59 = vand.u32 2147483647, %v560_v1 }
 0x9f0   :  { %v635_v52 = vor.u32 1.1754944e-38, %v634_v48  ;;  %vm633_vm3 = vcmp.eq.f32.partialorder %v632_v50, 8.507059e+37 }
 0x9f1   :  { %v573_v61 = vor.u32 1.1754944e-38, %v572_v58  ;;  %vm571_vm9 = vcmp.eq.f32.partialorder %v570_v59, 8.507059e+37 }
 0x9f4   :  { %v1291_v2 = vpop.eup %1290 }
 0x9f5   :  { %v624_v3 = vmul.f32 %v1291_v2, %v622_v34  ;;  %v1293_v44 = vpop.eup %1292  ;;  %vm629_vm0 = vweird.f32 %v1291_v2 }
 0x9f6   :  { %v562_v46 = vmul.f32 %v1293_v44, %v560_v1  ;;  %vm630_vm2 = vmor %vm628_vm1, %vm629_vm0  ;;  %vm567_vm6 = vweird.f32 %v1293_v44 }
 0x9f7   :  { %v625_v43 = vsub.f32 1.0, %v624_v3  ;;  %vm568_vm8 = vmor %vm566_vm7, %vm567_vm6 }
 0x9f8   :  { %v563_v49 = vsub.f32 1.0, %v562_v46 }
 0x9f9   :  { %v626_v45 = vmul.f32 %v1291_v2, %v625_v43 }
 0x9fa   :  { %v564_v53 = vmul.f32 %v1293_v44, %v563_v49 }
 0x9fb   :  { %v627_v47 = vadd.f32 %v1291_v2, %v626_v45 }
 0x9fc   :  { %v565_v57 = vadd.f32 %v1293_v44, %v564_v53 }
 0x9fd   :  { %v631_v51 = vsel %vm630_vm2, %v1291_v2, %v627_v47 }
 0x9fe   :  { %v636_v55 = vsel %vm633_vm3, %v635_v52, %v631_v51  ;;  %v569_v60 = vsel %vm568_vm8, %v1293_v44, %v565_v57 }
 0x9ff   :  { %v574_v63 = vsel %vm571_vm9, %v573_v61, %v569_v60  ;;  %v639_v5 = vmul.f32 %v636_v55, %v1670_v18 }
 0xa00   :  { %v577_v8 = vmul.f32 %v574_v63, %v1675_v25 }
 0xa3c   :  { %v642_v54 = vpop.permute.xlu1 %641 }
 0xa3d   :  { %v644_v56 = vmul.f32 %v642_v54, %v636_v55 }
 0xa3f   :  { %646 = vrot.lane.b32.xlu0 %v644_v56, %s1443_s15 }
 0xa45   :  { %v580_v62 = vpop.permute.xlu2 %579 }
 0xa46   :  { %v582_v4 = vmul.f32 %v580_v62, %v574_v63 }
 0xa48   :  { %584 = vrot.lane.b32.xlu1 %v582_v4, %s1443_s15 }
 0xab1   :  { %v647_v6 = vpop.permute.xlu0 %646 }
 0xab2   :  { %v1698_v7 = vadd.f32 %v647_v6, %v639_v5 }
 0xab4   :  { %1294 = vtanh.f32 %v1698_v7 }
 0xaba   :  { %v1295_v9 = vpop.eup %1294  ;;  %v585_v10 = vpop.permute.xlu1 %584 }
 0xabb   :  { %v1702_v11 = vadd.f32 %v585_v10, %v577_v8  ;;  %652 = vrot.lane.b32.xlu2 %v1295_v9, %s1442_s1  ;;  %v857_v9 = vld [vmem:[#allocation2 + $0x30] sm:$0xff] }
 0xabd   :  { %1296 = vtanh.f32 %v1702_v11 }
 0xac3   :  { %v1297_v12 = vpop.eup %1296 }
 0xac4   :  { %590 = vrot.lane.b32.xlu0 %v1297_v12, %s1442_s1 }
 0xb15   :  { %v653_v13 = vpop.permute.xlu2 %652 }
 0xb16   :  { %v655_v14 = vmul.f32 %v653_v13, %v636_v55 }
 0xb18   :  { %657 = vrot.lane.b32.xlu1 %v655_v14, %s1443_s15 }
 0xb36   :  { %v591_v15 = vpop.permute.xlu0 %590 }
 0xb37   :  { %v593_v16 = vmul.f32 %v591_v15, %v574_v63 }
 0xb39   :  { %661 = vrot.lane.b32.xlu2 %v593_v16, %s1442_s1 }
 0xb8a   :  { %v658_v17 = vpop.permute.xlu1 %657 }
 0xb8b   :  { %1203 = vmatmul.msk.f32.vlgmr.msra.gmra.mxu2 %vm73_vm4, %v658_v17 }
 0xb93   :  { %v662_v18 = vpop.permute.xlu2 %661 }
 0xb94   :  { %v664_v19 = vsel %vm73_vm4, %v658_v17, %v662_v18 }
 0xb95   :  { %1201 = vmatmul.msk.f32.vlgmr.msrb.gmra.mxu0 %vm140_vm5, %v664_v19 }
 0xc0e   :  { %v746_v23 = vpop.f32.mrf.mxu2 }
 0xc0f   :  { %v749_v25 = vadd.f32 %v746_v23, %v726_v21 }
 0xc11   :  { %1298 = vtanh.f32 %v749_v25  ;;  %v1204_v24 = vmul.f32 -1.442695, %v749_v25 }
 0xc12   :  { %v685_v27 = vpop.f32.mrf.mxu0 }
 0xc13   :  { %v686_v36 = vadd.f32 %v1595_v40, %v685_v27 }
 0xc15   :  { %1300 = vtanh.f32 %v686_v36  ;;  %v1202_v26 = vmul.f32 -1.442695, %v686_v36 }
 0xc16   :  { %1302 = vpow2.f32 %v1204_v24 }
 0xc17   :  { %v1299_v22 = vpop.eup %1298  ;;  %1304 = vpow2.f32 %v1202_v26 }
 0xc18   :  { %772 = vrot.lane.b32.xlu1 %v1299_v22, %s1442_s1 }
 0xc1b   :  { %v1301_v38 = vpop.eup %1300 }
 0xc1c   :  { %710 = vrot.lane.b32.xlu0 %v1301_v38, %s1442_s1  ;;  %v1303_v35 = vpop.eup %1302 }
 0xc1d   :  { %v753_v39 = vadd.f32 1.0, %v1303_v35  ;;  %v1305_v41 = vpop.eup %1304 }
 0xc1e   :  { %v691_v20 = vadd.f32 1.0, %v1305_v41 }
 0xc1f   :  { %1306 = vrcp.f32 %v753_v39  ;;  %v765_v37 = vand.u32 2147483648, %v753_v39  ;;  %vm759_vm11 = vweird.f32 %v753_v39  ;;  %v763_v1 = vand.u32 2147483647, %v753_v39 }
 0xc20   :  { %1308 = vrcp.f32 %v691_v20  ;;  %v703_v44 = vand.u32 2147483648, %v691_v20  ;;  %vm697_vm15 = vweird.f32 %v691_v20  ;;  %v701_v45 = vand.u32 2147483647, %v691_v20 }
 0xc21   :  { %v766_v43 = vor.u32 1.1754944e-38, %v765_v37  ;;  %vm764_vm14 = vcmp.eq.f32.partialorder %v763_v1, 8.507059e+37 }
 0xc22   :  { %v704_v50 = vor.u32 1.1754944e-38, %v703_v44  ;;  %vm702_vm1 = vcmp.eq.f32.partialorder %v701_v45, 8.507059e+37 }
 0xc25   :  { %v1307_v42 = vpop.eup %1306 }
 0xc26   :  { %v755_v0 = vmul.f32 %v1307_v42, %v753_v39  ;;  %v1309_v28 = vpop.eup %1308  ;;  %vm760_vm10 = vweird.f32 %v1307_v42 }
 0xc27   :  { %v693_v30 = vmul.f32 %v1309_v28, %v691_v20  ;;  %vm761_vm12 = vmor %vm759_vm11, %vm760_vm10  ;;  %vm698_vm13 = vweird.f32 %v1309_v28 }
 0xc28   :  { %v756_v29 = vsub.f32 1.0, %v755_v0  ;;  %vm699_vm0 = vmor %vm697_vm15, %vm698_vm13 }
 0xc29   :  { %v694_v32 = vsub.f32 1.0, %v693_v30 }
 0xc2a   :  { %v757_v31 = vmul.f32 %v1307_v42, %v756_v29 }
 0xc2b   :  { %v695_v34 = vmul.f32 %v1309_v28, %v694_v32 }
 0xc2c   :  { %v758_v33 = vadd.f32 %v1307_v42, %v757_v31 }
 0xc2d   :  { %v696_v3 = vadd.f32 %v1309_v28, %v695_v34 }
 0xc2e   :  { %v762_v2 = vsel %vm761_vm12, %v1307_v42, %v758_v33 }
 0xc2f   :  { %v767_v47 = vsel %vm764_vm14, %v766_v43, %v762_v2  ;;  %v700_v49 = vsel %vm699_vm0, %v1309_v28, %v696_v3 }
 0xc30   :  { %v705_v52 = vsel %vm702_vm1, %v704_v50, %v700_v49  ;;  %v770_v58 = vmul.f32 %v767_v47, %v1698_v7 }
 0xc31   :  { %v708_v54 = vmul.f32 %v705_v52, %v1702_v11 }
 0xc8a   :  { %v773_v46 = vpop.permute.xlu1 %772 }
 0xc8b   :  { %v775_v48 = vmul.f32 %v773_v46, %v767_v47 }
 0xc8d   :  { %777 = vrot.lane.b32.xlu0 %v775_v48, %s1443_s15 }
 0xc8e   :  { %v711_v51 = vpop.permute.xlu0 %710 }
 0xc8f   :  { %v713_v53 = vmul.f32 %v711_v51, %v705_v52 }
 0xc91   :  { %715 = vrot.lane.b32.xlu2 %v713_v53, %s1443_s15 }
 0xceb   :  { %v716_v55 = vpop.permute.xlu2 %715 }
 0xcec   :  { %v1718_v56 = vadd.f32 %v716_v55, %v708_v54 }
 0xcee   :  { %1310 = vtanh.f32 %v1718_v56 }
 0xcf4   :  { %v1311_v57 = vpop.eup %1310 }
 0xcf5   :  { %721 = vrot.lane.b32.xlu1 %v1311_v57, %s1442_s1  ;;  %v988_v57 = vld [vmem:[#allocation2 + $0x38] sm:$0xff] }
 0xcff   :  { %v778_v59 = vpop.permute.xlu0 %777 }
 0xd00   :  { %v1723_v60 = vadd.f32 %v778_v59, %v770_v58 }
 0xd02   :  { %1312 = vtanh.f32 %v1723_v60 }
 0xd08   :  { %v1313_v61 = vpop.eup %1312 }
 0xd09   :  { %783 = vrot.lane.b32.xlu2 %v1313_v61, %s1442_s1 }
 0xd63   :  { %v784_v62 = vpop.permute.xlu2 %783 }
 0xd64   :  { %v786_v63 = vmul.f32 %v784_v62, %v767_v47  ;;  %v1756_v62 = vld [vmem:[%s1800_s3] ss:$0 sm:$0xff] }
 0xd66   :  { %788 = vrot.lane.b32.xlu0 %v786_v63, %s1443_s15 }
 0xd67   :  { %v722_v4 = vpop.permute.xlu1 %721 }
 0xd68   :  { %v724_v5 = vmul.f32 %v722_v4, %v705_v52 }
 0xd6a   :  { %792 = vrot.lane.b32.xlu1 %v724_v5, %s1442_s1 }
 0xdd8   :  { %v789_v6 = vpop.permute.xlu0 %788 }
 0xdd9   :  { %1207 = vmatmul.msk.f32.vlgmr.msra.gmra.mxu1 %vm73_vm4, %v789_v6 }
 0xddc   :  { %v793_v7 = vpop.permute.xlu1 %792 }
 0xddd   :  { %v795_v8 = vsel %vm73_vm4, %v789_v6, %v793_v7 }
 0xdde   :  { %1205 = vmatmul.msk.f32.vlgmr.msra.gmra.mxu3 %vm140_vm5, %v795_v8 }
 0xe56   :  { %v877_v10 = vpop.f32.mrf.mxu1 }
 0xe57   :  { %v880_v11 = vadd.f32 %v877_v10, %v857_v9 }
 0xe59   :  { %1314 = vtanh.f32 %v880_v11  ;;  %v1208_v18 = vmul.f32 -1.442695, %v880_v11 }
 0xe5f   :  { %v1315_v12 = vpop.eup %1314 }
 0xe60   :  { %903 = vrot.lane.b32.xlu0 %v1315_v12, %s1442_s1 }
 0xe61   :  { %v816_v13 = vpop.f32.mrf.mxu3 }
 0xe62   :  { %v817_v14 = vadd.f32 %v1595_v40, %v816_v13 }
 0xe64   :  { %1316 = vtanh.f32 %v817_v14  ;;  %v1206_v16 = vmul.f32 -1.442695, %v817_v14 }
 0xe66   :  { %1318 = vpow2.f32 %v1206_v16 }
 0xe67   :  { %1320 = vpow2.f32 %v1208_v18 }
 0xe6a   :  { %v1317_v15 = vpop.eup %1316 }
 0xe6b   :  { %841 = vrot.lane.b32.xlu2 %v1317_v15, %s1442_s1 }
 0xe6c   :  { %v1319_v17 = vpop.eup %1318 }
 0xe6d   :  { %v822_v19 = vadd.f32 1.0, %v1319_v17  ;;  %v1321_v21 = vpop.eup %1320 }
 0xe6e   :  { %v884_v25 = vadd.f32 1.0, %v1321_v21 }
 0xe6f   :  { %1322 = vrcp.f32 %v822_v19  ;;  %v834_v26 = vand.u32 2147483648, %v822_v19  ;;  %vm828_vm3 = vweird.f32 %v822_v19  ;;  %v832_v35 = vand.u32 2147483647, %v822_v19 }
 0xe70   :  { %1324 = vrcp.f32 %v884_v25  ;;  %v896_v31 = vand.u32 2147483648, %v884_v25  ;;  %vm890_vm9 = vweird.f32 %v884_v25  ;;  %v894_v32 = vand.u32 2147483647, %v884_v25 }
 0xe71   :  { %v835_v20 = vor.u32 1.1754944e-38, %v834_v26  ;;  %vm833_vm7 = vcmp.eq.f32.partialorder %v832_v35, 8.507059e+37 }
 0xe72   :  { %v897_v34 = vor.u32 1.1754944e-38, %v896_v31  ;;  %vm895_vm11 = vcmp.eq.f32.partialorder %v894_v32, 8.507059e+37 }
 0xe75   :  { %v1323_v23 = vpop.eup %1322 }
 0xe76   :  { %v824_v27 = vmul.f32 %v1323_v23, %v822_v19  ;;  %v1325_v38 = vpop.eup %1324  ;;  %vm829_vm2 = vweird.f32 %v1323_v23 }
 0xe77   :  { %v886_v24 = vmul.f32 %v1325_v38, %v884_v25  ;;  %vm830_vm6 = vmor %vm828_vm3, %vm829_vm2  ;;  %vm891_vm8 = vweird.f32 %v1325_v38 }
 0xe78   :  { %v825_v36 = vsub.f32 1.0, %v824_v27  ;;  %vm892_vm10 = vmor %vm890_vm9, %vm891_vm8  ;;  %vm1151_vm9 = vcmask 162816  }
 0xe79   :  { %v887_v41 = vsub.f32 1.0, %v886_v24 }
 0xe7a   :  { %v826_v22 = vmul.f32 %v1323_v23, %v825_v36 }
 0xe7b   :  { %v888_v29 = vmul.f32 %v1325_v38, %v887_v41 }
 0xe7c   :  { %v827_v40 = vadd.f32 %v1323_v23, %v826_v22 }
 0xe7d   :  { %v889_v30 = vadd.f32 %v1325_v38, %v888_v29 }
 0xe7e   :  { %v831_v39 = vsel %vm830_vm6, %v1323_v23, %v827_v40 }
 0xe7f   :  { %v836_v0 = vsel %vm833_vm7, %v835_v20, %v831_v39  ;;  %v893_v33 = vsel %vm892_vm10, %v1325_v38, %v889_v30 }
 0xe80   :  { %v898_v1 = vsel %vm895_vm11, %v897_v34, %v893_v33  ;;  %v839_v46 = vmul.f32 %v836_v0, %v1718_v56 }
 0xe81   :  { %v901_v3 = vmul.f32 %v898_v1, %v1723_v60 }
 0xec5   :  { %v842_v42 = vpop.permute.xlu2 %841 }
 0xec6   :  { %v844_v28 = vmul.f32 %v842_v42, %v836_v0 }
 0xec8   :  { %846 = vrot.lane.b32.xlu1 %v844_v28, %s1443_s15 }
 0xed2   :  { %v904_v37 = vpop.permute.xlu0 %903 }
 0xed3   :  { %v906_v2 = vmul.f32 %v904_v37, %v898_v1 }
 0xed5   :  { %908 = vrot.lane.b32.xlu2 %v906_v2, %s1443_s15 }
 0xf2f   :  { %v909_v43 = vpop.permute.xlu2 %908 }
 0xf30   :  { %v1738_v44 = vadd.f32 %v909_v43, %v901_v3 }
 0xf32   :  { %1326 = vtanh.f32 %v1738_v44 }
 0xf38   :  { %v1327_v45 = vpop.eup %1326 }
 0xf39   :  { %914 = vrot.lane.b32.xlu1 %v1327_v45, %s1442_s1 }
 0xf3a   :  { %v847_v47 = vpop.permute.xlu1 %846 }
 0xf3b   :  { %v1743_v48 = vadd.f32 %v847_v47, %v839_v46 }
 0xf3d   :  { %1328 = vtanh.f32 %v1743_v48 }
 0xf43   :  { %v1329_v49 = vpop.eup %1328 }
 0xf44   :  { %852 = vrot.lane.b32.xlu0 %v1329_v49, %s1442_s1 }
 0xfab   :  { %v915_v50 = vpop.permute.xlu1 %914 }
 0xfac   :  { %v917_v51 = vmul.f32 %v915_v50, %v898_v1 }
 0xfae   :  { %919 = vrot.lane.b32.xlu2 %v917_v51, %s1443_s15 }
 0xfb6   :  { %v853_v52 = vpop.permute.xlu0 %852 }
 0xfb7   :  { %v855_v53 = vmul.f32 %v853_v52, %v836_v0 }
 0xfb9   :  { %923 = vrot.lane.b32.xlu0 %v855_v53, %s1442_s1 }
0x1008   :  { %v920_v54 = vpop.permute.xlu2 %919 }
0x1009   :  { %1211 = vmatmul.msk.f32.vlgmr.msra.gmra.mxu0 %vm73_vm4, %v920_v54 }
0x102b   :  { %v924_v55 = vpop.permute.xlu0 %923 }
0x102c   :  { %v926_v56 = vsel %vm73_vm4, %v920_v54, %v924_v55 }
0x102d   :  { %1209 = vmatmul.msk.f32.vlgmr.msrb.gmra.mxu2 %vm140_vm5, %v926_v56 }
0x1086   :  { %v1008_v58 = vpop.f32.mrf.mxu0 }
0x1087   :  { %v1011_v59 = vadd.f32 %v1008_v58, %v988_v57 }
0x1089   :  { %1330 = vtanh.f32 %v1011_v59  ;;  %v1212_v5 = vmul.f32 -1.442695, %v1011_v59 }
0x108f   :  { %v1331_v60 = vpop.eup %1330 }
0x1090   :  { %1034 = vrot.lane.b32.xlu2 %v1331_v60, %s1442_s1 }
0x10b0   :  { %v947_v61 = vpop.f32.mrf.mxu2 }
0x10b1   :  { %v948_v63 = vadd.f32 %v1756_v62, %v947_v61 }
0x10b3   :  { %1332 = vtanh.f32 %v948_v63  ;;  %v1210_v21 = vmul.f32 -1.442695, %v948_v63 }
0x10b4   :  { %1334 = vpow2.f32 %v1212_v5 }
0x10b9   :  { %v1333_v4 = vpop.eup %1332 }
0x10ba   :  { %972 = vrot.lane.b32.xlu1 %v1333_v4, %s1442_s1  ;;  %v1335_v6 = vpop.eup %1334 }
0x10bb   :  { %v1015_v7 = vadd.f32 1.0, %v1335_v6 }
0x10bd   :  { %1336 = vrcp.f32 %v1015_v7  ;;  %v1027_v13 = vand.u32 2147483648, %v1015_v7  ;;  %vm1021_vm13 = vweird.f32 %v1015_v7  ;;  %v1025_v14 = vand.u32 2147483647, %v1015_v7 }
0x10be   :  { %1338 = vpow2.f32 %v1210_v21 }
0x10bf   :  { %v1028_v16 = vor.u32 1.1754944e-38, %v1027_v13  ;;  %vm1026_vm15 = vcmp.eq.f32.partialorder %v1025_v14, 8.507059e+37 }
0x10c3   :  { %v1337_v8 = vpop.eup %1336 }
0x10c4   :  { %v1017_v9 = vmul.f32 %v1337_v8, %v1015_v7  ;;  %vm1022_vm12 = vweird.f32 %v1337_v8  ;;  %v1339_v23 = vpop.eup %1338 }
0x10c5   :  { %vm1023_vm14 = vmor %vm1021_vm13, %vm1022_vm12  ;;  %v953_v25 = vadd.f32 1.0, %v1339_v23 }
0x10c6   :  { %v1018_v10 = vsub.f32 1.0, %v1017_v9  ;;  %v1120_v9 = vld [vmem:[%s1801_s4 + $0x10] sm:$0xff] }
0x10c7   :  { %1340 = vrcp.f32 %v953_v25  ;;  %v965_v24 = vand.u32 2147483648, %v953_v25  ;;  %vm959_vm1 = vweird.f32 %v953_v25  ;;  %v963_v26 = vand.u32 2147483647, %v953_v25 }
0x10c8   :  { %v1019_v11 = vmul.f32 %v1337_v8, %v1018_v10  ;;  %v1119_v10 = vld [vmem:[%s1801_s4 + $0x8] sm:$0xff] }
0x10c9   :  { %v966_v39 = vor.u32 1.1754944e-38, %v965_v24  ;;  %vm964_vm3 = vcmp.eq.f32.partialorder %v963_v26, 8.507059e+37 }
0x10ca   :  { %v1020_v12 = vadd.f32 %v1337_v8, %v1019_v11  ;;  %v1118_v11 = vld [vmem:[%s1801_s4] sm:$0xff] }
0x10cc   :  { %v1024_v15 = vsel %vm1023_vm14, %v1337_v8, %v1020_v12  ;;  %v1121_v8 = vld [vmem:[%s1801_s4 + $0x18] sm:$0xff]  ;;  %s1444_s4 = smov [#allocation7]  }
0x10cd   :  { %v1029_v18 = vsel %vm1026_vm15, %v1028_v16, %v1024_v15  ;;  %v1341_v27 = vpop.eup %1340  ;;  %1143 = vmatpush.msrb.mxu3 %v1121_v8  ;;  %v1225_v15 = vld [vmem:[%s1802_s5] ss:$0 sm:$0xff]  ;;  %s1171_s5 = sshll.u32 %s1444_s4, 4  ;;  %s1172_s5 = int_to_ptr.vmem [resolvable:$true] %s1171_s5 }
0x10ce   :  { %v955_v36 = vmul.f32 %v1341_v27, %v953_v25  ;;  %vm960_vm0 = vweird.f32 %v1341_v27  ;;  %v1032_v0 = vmul.f32 %v1029_v18, %v1738_v44 }
0x10cf   :  { %vm961_vm2 = vmor %vm959_vm1, %vm960_vm0  ;;  %1144 = vmatpush.msrb.mxu3 %v1120_v9 }
0x10d0   :  { %v956_v22 = vsub.f32 1.0, %v955_v36 }
0x10d1   :  { %1145 = vmatpush.msrb.mxu3 %v1119_v10 }
0x10d2   :  { %v957_v38 = vmul.f32 %v1341_v27, %v956_v22 }
0x10d3   :  { %1146 = vmatpush.msrb.mxu3 %v1118_v11 }
0x10d4   :  { %v958_v40 = vadd.f32 %v1341_v27, %v957_v38 }
0x10d6   :  { %v962_v35 = vsel %vm961_vm2, %v1341_v27, %v958_v40 }
0x10d7   :  { %v967_v20 = vsel %vm964_vm3, %v966_v39, %v962_v35 }
0x10d8   :  { %v970_v31 = vmul.f32 %v967_v20, %v1743_v48 }
0x10ea   :  { %v1035_v17 = vpop.permute.xlu2 %1034 }
0x10eb   :  { %v1037_v19 = vmul.f32 %v1035_v17, %v1029_v18 }
0x10ed   :  { %1039 = vrot.lane.b32.xlu1 %v1037_v19, %s1443_s15 }
0x112c   :  { %v973_v41 = vpop.permute.xlu1 %972 }
0x112d   :  { %v975_v42 = vmul.f32 %v973_v41, %v967_v20 }
0x112f   :  { %977 = vrot.lane.b32.xlu0 %v975_v42, %s1443_s15 }
0x115f   :  { %v1040_v28 = vpop.permute.xlu1 %1039 }
0x1160   :  { %v1042_v29 = vadd.f32 %v1040_v28, %v1032_v0 }
0x1162   :  { %1342 = vtanh.f32 %v1042_v29 }
0x1168   :  { %v1343_v30 = vpop.eup %1342 }
0x1169   :  { %1045 = vrot.lane.b32.xlu0 %v1343_v30, %s1442_s1 }
0x11a1   :  { %v978_v32 = vpop.permute.xlu0 %977 }
0x11a2   :  { %v980_v33 = vadd.f32 %v978_v32, %v970_v31 }
0x11a4   :  { %1344 = vtanh.f32 %v980_v33 }
0x11aa   :  { %v1345_v34 = vpop.eup %1344 }
0x11ab   :  { %983 = vrot.lane.b32.xlu2 %v1345_v34, %s1442_s1 }
0x11db   :  { %v1046_v37 = vpop.permute.xlu0 %1045 }
0x11dc   :  { %v1048_v1 = vmul.f32 %v1046_v37, %v1029_v18 }
0x11de   :  { %1050 = vrot.lane.b32.xlu1 %v1048_v1, %s1443_s15 }
0x1205   :  { %v984_v2 = vpop.permute.xlu2 %983 }
0x1206   :  { %v986_v3 = vmul.f32 %v984_v2, %v967_v20 }
0x1208   :  { %1054 = vrot.lane.b32.xlu2 %v986_v3, %s1442_s1 }
0x1250   :  { %v1051_v43 = vpop.permute.xlu1 %1050 }
0x1262   :  { %v1055_v44 = vpop.permute.xlu2 %1054 }
0x1263   :  { %v1057_v45 = vsel %vm73_vm4, %v1051_v43, %v1055_v44 }
0x1264   :  { %1213 = vmatmul.msk.f32.vlgmr.msrb.gmra.mxu1 %vm140_vm5, %v1057_v45 }
0x12e1   :  { %v1078_v46 = vpop.f32.mrf.mxu1 }
0x12e2   :  { %v1079_v47 = vadd.f32 %v1756_v62, %v1078_v46 }
0x12e4   :  { %1346 = vtanh.f32 %v1079_v47  ;;  %v1214_v49 = vmul.f32 -1.442695, %v1079_v47 }
0x12e6   :  { %1348 = vpow2.f32 %v1214_v49 }
0x12ea   :  { %v1347_v48 = vpop.eup %1346 }
0x12eb   :  { %1103 = vrot.lane.b32.xlu0 %v1347_v48, %s1442_s1 }
0x12ec   :  { %v1349_v50 = vpop.eup %1348 }
0x12ed   :  { %v1084_v51 = vadd.f32 1.0, %v1349_v50 }
0x12ef   :  { %1350 = vrcp.f32 %v1084_v51  ;;  %v1096_v57 = vand.u32 2147483648, %v1084_v51  ;;  %vm1090_vm5 = vweird.f32 %v1084_v51  ;;  %v1094_v58 = vand.u32 2147483647, %v1084_v51 }
0x12f1   :  { %v1097_v60 = vor.u32 1.1754944e-38, %v1096_v57  ;;  %vm1095_vm8 = vcmp.eq.f32.partialorder %v1094_v58, 8.507059e+37 }
0x12f5   :  { %v1351_v52 = vpop.eup %1350 }
0x12f6   :  { %v1086_v53 = vmul.f32 %v1351_v52, %v1084_v51  ;;  %vm1091_vm6 = vweird.f32 %v1351_v52 }
0x12f7   :  { %vm1092_vm7 = vmor %vm1090_vm5, %vm1091_vm6 }
0x12f8   :  { %v1087_v54 = vsub.f32 1.0, %v1086_v53 }
0x12fa   :  { %v1088_v55 = vmul.f32 %v1351_v52, %v1087_v54 }
0x12fc   :  { %v1089_v56 = vadd.f32 %v1351_v52, %v1088_v55 }
0x12fe   :  { %v1093_v59 = vsel %vm1092_vm7, %v1351_v52, %v1089_v56 }
0x12ff   :  { %v1098_v62 = vsel %vm1095_vm8, %v1097_v60, %v1093_v59 }
0x1300   :  { %v1101_v4 = vmul.f32 %v1098_v62, %v980_v33 }
0x135d   :  { %v1104_v61 = vpop.permute.xlu0 %1103 }
0x135e   :  { %v1106_v63 = vmul.f32 %v1104_v61, %v1098_v62 }
0x1360   :  { %1108 = vrot.lane.b32.xlu1 %v1106_v63, %s1443_s15 }
0x13d2   :  { %v1109_v5 = vpop.permute.xlu1 %1108 }
0x13d3   :  { %v1111_v6 = vadd.f32 %v1109_v5, %v1101_v4 }
0x13d5   :  { %1352 = vtanh.f32 %v1111_v6 }
0x13db   :  { %v1353_v7 = vpop.eup %1352 }
0x13dc   :  { %1114 = vrot.lane.b32.xlu2 %v1353_v7, %s1442_s1 }
0x1436   :  { %v1115_v12 = vpop.permute.xlu2 %1114 }
0x1437   :  { %v1117_v13 = vmul.f32 %v1115_v12, %v1098_v62 }
0x1439   :  { %1127 = vrot.lane.b32.xlu0 %v1117_v13, %s1443_s15 }
0x14ab   :  { %v1128_v14 = vpop.permute.xlu0 %1127 }
0x14ac   :  { %1215 = vmatmul.msk.f32.vlgmr.msrb.gmra.mxu3 %vm73_vm4, %v1128_v14 }
0x152f   :  { %v1148_v16 = vpop.f32.mrf.mxu3 }
0x1530   :  { %v1149_v17 = vadd.f32 %v1225_v15, %v1148_v16 }
0x1532   :  { %v1152_v18 = vsel %vm1151_vm9, %v1149_v17, -inf }
0x1533   :  { %1153 = vmax.xlane.f32.xlu1 %v1152_v18 }
0x15a6   :  { %v1154_v19 = vpop.xlane.xlu1 %1153 }
0x15a7   :  { %v1155_v21 = vsub.f32 %v1149_v17, %v1154_v19 }
0x15a9   :  { %v1156_v23 = vmul.f32 1.442695, %v1155_v21 }
0x15ab   :  { %1354 = vpow2.f32 %v1156_v23 }
0x15b1   :  { %v1355_v25 = vpop.eup %1354 }
0x15b2   :  { %v1158_v27 = vsel %vm1151_vm9, %v1355_v25, 0.0 }
0x15b3   :  { %1159 = vadd.xlane.f32.xlu2 %v1158_v27 }
0x1626   :  { %v1160_v36 = vpop.xlane.xlu2 %1159 }
0x1627   :  { %1356 = vlog2.f32 %v1160_v36 }
0x162d   :  { %v1357_v22 = vpop.eup %1356 }
0x162e   :  { %v1162_v38 = vmul.f32 0.6931472, %v1357_v22 }
0x1630   :  { %v1163_v40 = vadd.f32 %v1162_v38, %v1154_v19 }
0x1632   :  { %v1164_v24 = vsub.f32 %v1149_v17, %v1163_v40 }
0x1634   :  { %1165 = vst.msk [vmem:[#allocation7] sm:$0xff] %vm1151_vm9, %v1164_v24 }
0x1635   :  { %1176 = dma.vmem_to_hbm [thread:$0]  %s1172_s5, 128, %s1174_s7, [#allocation4]  }
0x1636   :  { %1435 = dma.done.wait [#allocation4], 128  }
0x1637   :  { %1436 = vsyncadd [#allocation4], 4294967168 }
0x1638   :  { %1181 = vsyncpa [#allocation3], 1 }
0x1639   :  { %1182 = vsyncpa [#allocation6], 1 }
0x163a   :  { %1183 = vsyncpa [#allocation4], 1 }

</bundles_post_ra>
